<compile_context>
chip_gen: v6e
topology: v6e:2x2x1
jax: 0.10.0
libtpu: 0.0.40
codegen_flags: <defaults>
</compile_context>

<pallas_src>
import jax
import jax.numpy as jnp
from jax.experimental import pallas as pl
from jax.experimental.pallas import tpu as pltpu

NF = 512        # hidden width of the discriminator
W5_PAD = 128    # MXU-friendly padded width of the final (512, 1) weight


def _mlp_kernel(z_ref, c_ref,
                w1z_ref, w1c_ref, b1_ref,
                w2_ref, b2_ref,
                w3_ref, b3_ref,
                w4_ref, b4_ref,
                w5_ref, b5_ref,
                o_ref):
    """One batch tile of the 5-layer MLP (4x Linear+ReLU, 1x Linear+Sigmoid)."""
    f32 = jnp.float32
    bf16 = jnp.bfloat16

    def epilogue(y_f32, b_ref):
        # bias add + ReLU in the bias dtype (bf16 on v6e/v7x, f32 on v5e);
        # result always bf16 so the next matmul streams at full MXU rate.
        y = y_f32.astype(b_ref.dtype) + b_ref[...]
        return jnp.maximum(y, 0.0).astype(bf16)

    # fc1 with the concat fused: relu(z @ W1z + c @ W1c + b1)
    y = jnp.dot(z_ref[...], w1z_ref[...], preferred_element_type=f32)
    y = y + jnp.dot(c_ref[...], w1c_ref[...], preferred_element_type=f32)
    h = epilogue(y, b1_ref)

    h = epilogue(jnp.dot(h, w2_ref[...], preferred_element_type=f32), b2_ref)
    h = epilogue(jnp.dot(h, w3_ref[...], preferred_element_type=f32), b3_ref)
    h = epilogue(jnp.dot(h, w4_ref[...], preferred_element_type=f32), b4_ref)

    # fc5 + sigmoid: padded (512, 128) weight keeps the MXU happy, but only
    # column 0 is real -> slice it, tiny f32 epilogue, narrow (tb, 1) store.
    logits = jnp.dot(h, w5_ref[...], preferred_element_type=f32)
    logit = logits[:, :1] + b5_ref[...]
    o_ref[...] = jax.nn.sigmoid(logit).astype(o_ref.dtype)


def _round_up(x, m):
    return ((x + m - 1) // m) * m


def _epilogue_dtype_for_backend():
    """bf16 epilogue on chips with a bf16 VPU (v6e/v7x); f32 otherwise."""
    try:
        kind = jax.devices()[0].device_kind.lower()
    except Exception:
        return jnp.float32
    return jnp.bfloat16 if ("v6" in kind or "v7" in kind) else jnp.float32


def init_params(key, zdim, cdim, nf=NF):
    """Deterministic synthetic f32 parameters. Weights stored as (in, out)."""
    dims = [(zdim + cdim, nf), (nf, nf), (nf, nf), (nf, nf), (nf, 1)]
    params = []
    for din, dout in dims:
        key, kw, kb = jax.random.split(key, 3)
        scale = 1.0 / jnp.sqrt(jnp.float32(din))  # ~ PyTorch default Linear init
        w = jax.random.uniform(kw, (din, dout), jnp.float32, -scale, scale)
        b = jax.random.uniform(kb, (dout,), jnp.float32, -scale, scale)
        params += [w, b]
    return tuple(params)


def prepare_params(params, zdim, *, epilogue_dtype=None):
    """One-time conversion of f32 params into the kernel layout.

      * weights cast to bf16 (half the bytes, 2x MXU rate)
      * W1 split into z-half and c-half (fuses the concat into the kernel)
      * hidden biases stored as (1, 512) in the epilogue dtype
      * final weight padded to (512, 128) for the MXU; final bias kept f32
    """
    if epilogue_dtype is None:
        epilogue_dtype = _epilogue_dtype_for_backend()
    (w1, b1, w2, b2, w3, b3, w4, b4, w5, b5) = params
    bf16 = jnp.bfloat16
    edt = epilogue_dtype

    w1z = w1[:zdim].astype(bf16)
    w1c = w1[zdim:].astype(bf16)
    w5p = jnp.zeros((w5.shape[0], W5_PAD), bf16).at[:, :1].set(w5.astype(bf16))

    return (w1z, w1c, b1.reshape(1, -1).astype(edt),
            w2.astype(bf16), b2.reshape(1, -1).astype(edt),
            w3.astype(bf16), b3.reshape(1, -1).astype(edt),
            w4.astype(bf16), b4.reshape(1, -1).astype(edt),
            w5p, b5.reshape(1, 1).astype(jnp.float32))


def discriminator_zc_forward(z_src, c_src, prepared, *, batch_tile=1024):
    """Pallas wrapper. z_src: (B, zdim), c_src: (B, cdim). Returns (B, 1) f32."""
    B, zdim = z_src.shape
    cdim = c_src.shape[1]

    # Batch tile: >= 8 sublanes, capped at batch_tile; for larger B aim for
    # >= 2 tiles so the "parallel" batch axis shards across both TCs on v7x.
    tb = min(batch_tile, max(8, _round_up(pl.cdiv(B, 2), 8)))
    num_tiles = pl.cdiv(B, tb)
    b_pad = num_tiles * tb

    # Inputs stream in bf16 (precision is already bf16-bound by the weights).
    z = z_src.astype(jnp.bfloat16)
    c = c_src.astype(jnp.bfloat16)
    if b_pad != B:
        z = jnp.pad(z, ((0, b_pad - B), (0, 0)))
        c = jnp.pad(c, ((0, b_pad - B), (0, 0)))

    (w1z, w1c, b1, w2, b2, w3, b3, w4, b4, w5p, b5) = prepared

    def row_spec(feat):
        return pl.BlockSpec((tb, feat), lambda i: (i, 0))

    def resident(arr):  # same block every grid step -> stays VMEM-resident
        return pl.BlockSpec(arr.shape, lambda i: (0, 0))

    in_specs = [
        row_spec(zdim), row_spec(cdim),
        resident(w1z), resident(w1c), resident(b1),
        resident(w2), resident(b2),
        resident(w3), resident(b3),
        resident(w4), resident(b4),
        resident(w5p), resident(b5),
    ]

    weight_bytes = sum(int(a.size) * a.dtype.itemsize
                       for a in (w1z, w1c, b1, w2, b2, w3, b3, w4, b4, w5p, b5))
    cost = pl.CostEstimate(
        flops=int(2 * b_pad * (zdim * NF + cdim * NF + 3 * NF * NF + NF * W5_PAD)),
        transcendentals=int(b_pad),
        bytes_accessed=int(z.size * 2 + c.size * 2 + weight_bytes + b_pad * 4),
    )

    out = pl.pallas_call(
        _mlp_kernel,
        out_shape=jax.ShapeDtypeStruct((b_pad, 1), jnp.float32),
        grid=(num_tiles,),
        in_specs=in_specs,
        out_specs=pl.BlockSpec((tb, 1), lambda i: (i, 0)),
        compiler_params=pltpu.CompilerParams(
            dimension_semantics=("parallel",),   # batch tiles shard across TCs
            vmem_limit_bytes=48 * 1024 * 1024,   # headroom for large tb (v5e: 16 MiB default)
        ),
        cost_estimate=cost,
    )(z, c, w1z, w1c, b1, w2, b2, w3, b3, w4, b4, w5p, b5)

    # Padded rows (B..b_pad-1) hold sigmoid(bias-chain) garbage; slice them off
    # before any downstream reduction.
    return out if b_pad == B else out[:B]


def reference_forward(z_src, c_src, params):
    """Pure-JAX f32 reference matching the PyTorch module."""
    x = jnp.concatenate([z_src, c_src], axis=1).astype(jnp.float32)
    (w1, b1, w2, b2, w3, b3, w4, b4, w5, b5) = params
    h = jax.nn.relu(x @ w1 + b1)
    h = jax.nn.relu(h @ w2 + b2)
    h = jax.nn.relu(h @ w3 + b3)
    h = jax.nn.relu(h @ w4 + b4)
    return jax.nn.sigmoid(h @ w5 + b5)


if __name__ == "__main__":
    key = jax.random.PRNGKey(0)
    B, zdim, cdim = 8, 16, 16

    kp, kz, kc = jax.random.split(key, 3)
    params = init_params(kp, zdim, cdim)
    prepared = prepare_params(params, zdim)   # one-time, hoisted out of forward

    z_src = jax.random.normal(kz, (B, zdim), jnp.float32)
    c_src = jax.random.normal(kc, (B, cdim), jnp.float32)

    out = discriminator_zc_forward(z_src, c_src, prepared)
    out = jax.block_until_ready(out)

    ref = reference_forward(z_src, c_src, params)
    assert out.shape == (B, 1), out.shape
    # bf16 weight/input streaming: expect ~1e-2-level agreement with f32 ref.
    assert jnp.allclose(out, ref, atol=3e-2, rtol=3e-2), (out, ref)

    print("KERNEL_OK")
</pallas_src>

<mosaic_0001>
module attributes {stable_mosaic.version = 11 : i64} {
  func.func @_mlp_kernel(%arg0: i32, %arg1: memref<8x16xbf16, #tpu.memory_space<vmem>>, %arg2: memref<8x16xbf16, #tpu.memory_space<vmem>>, %arg3: memref<16x512xbf16, #tpu.memory_space<vmem>>, %arg4: memref<16x512xbf16, #tpu.memory_space<vmem>>, %arg5: memref<1x512xf32, #tpu.memory_space<vmem>>, %arg6: memref<512x512xbf16, #tpu.memory_space<vmem>>, %arg7: memref<1x512xf32, #tpu.memory_space<vmem>>, %arg8: memref<512x512xbf16, #tpu.memory_space<vmem>>, %arg9: memref<1x512xf32, #tpu.memory_space<vmem>>, %arg10: memref<512x512xbf16, #tpu.memory_space<vmem>>, %arg11: memref<1x512xf32, #tpu.memory_space<vmem>>, %arg12: memref<512x128xbf16, #tpu.memory_space<vmem>>, %arg13: memref<1x1xf32, #tpu.memory_space<vmem>>, %arg14: memref<8x1xf32, #tpu.memory_space<vmem>>) attributes {dimension_semantics = [#tpu.dimension_semantics<parallel>], iteration_bounds = array<i64: 1>, scalar_prefetch = 0 : i64, scratch_operands = 0 : i64, tpu.core_type = #tpu.core_type<tc>, window_params = [{transform_indices = @transform_0, window_bounds = array<i64: 8, 16>}, {transform_indices = @transform_1, window_bounds = array<i64: 8, 16>}, {pipeline_mode = #tpu.pipeline_mode<synchronous>, transform_indices = @transform_2, window_bounds = array<i64: 16, 512>}, {pipeline_mode = #tpu.pipeline_mode<synchronous>, transform_indices = @transform_3, window_bounds = array<i64: 16, 512>}, {pipeline_mode = #tpu.pipeline_mode<synchronous>, transform_indices = @transform_4, window_bounds = array<i64: 1, 512>}, {pipeline_mode = #tpu.pipeline_mode<synchronous>, transform_indices = @transform_5, window_bounds = array<i64: 512, 512>}, {pipeline_mode = #tpu.pipeline_mode<synchronous>, transform_indices = @transform_6, window_bounds = array<i64: 1, 512>}, {pipeline_mode = #tpu.pipeline_mode<synchronous>, transform_indices = @transform_7, window_bounds = array<i64: 512, 512>}, {pipeline_mode = #tpu.pipeline_mode<synchronous>, transform_indices = @transform_8, window_bounds = array<i64: 1, 512>}, {pipeline_mode = #tpu.pipeline_mode<synchronous>, transform_indices = @transform_9, window_bounds = array<i64: 512, 512>}, {pipeline_mode = #tpu.pipeline_mode<synchronous>, transform_indices = @transform_10, window_bounds = array<i64: 1, 512>}, {pipeline_mode = #tpu.pipeline_mode<synchronous>, transform_indices = @transform_11, window_bounds = array<i64: 512, 128>}, {pipeline_mode = #tpu.pipeline_mode<synchronous>, transform_indices = @transform_12, window_bounds = array<i64: 1, 1>}, {transform_indices = @transform_13, window_bounds = array<i64: 8, 1>}]} {
    %c0 = arith.constant 0 : index
    %c0_0 = arith.constant 0 : index
    %0 = vector.load %arg1[%c0, %c0_0] : memref<8x16xbf16, #tpu.memory_space<vmem>>, vector<8x16xbf16>
    %c0_1 = arith.constant 0 : index
    %c0_2 = arith.constant 0 : index
    %1 = vector.load %arg3[%c0_1, %c0_2] : memref<16x512xbf16, #tpu.memory_space<vmem>>, vector<16x512xbf16>
    %cst = arith.constant dense<0.000000e+00> : vector<8x512xf32>
    %2 = tpu.matmul %0, %1, %cst {dimension_numbers = #tpu.dot_dimension_numbers<[1], [0], [0], [1], [0, 0, 1, 1], [], []>} : vector<8x16xbf16>, vector<16x512xbf16>, vector<8x512xf32> -> vector<8x512xf32>
    %c0_3 = arith.constant 0 : index
    %c0_4 = arith.constant 0 : index
    %3 = vector.load %arg2[%c0_3, %c0_4] : memref<8x16xbf16, #tpu.memory_space<vmem>>, vector<8x16xbf16>
    %c0_5 = arith.constant 0 : index
    %c0_6 = arith.constant 0 : index
    %4 = vector.load %arg4[%c0_5, %c0_6] : memref<16x512xbf16, #tpu.memory_space<vmem>>, vector<16x512xbf16>
    %cst_7 = arith.constant dense<0.000000e+00> : vector<8x512xf32>
    %5 = tpu.matmul %3, %4, %cst_7 {dimension_numbers = #tpu.dot_dimension_numbers<[1], [0], [0], [1], [0, 0, 1, 1], [], []>} : vector<8x16xbf16>, vector<16x512xbf16>, vector<8x512xf32> -> vector<8x512xf32>
    %6 = arith.addf %2, %5 : vector<8x512xf32>
    %c0_8 = arith.constant 0 : index
    %c0_9 = arith.constant 0 : index
    %7 = vector.load %arg5[%c0_8, %c0_9] : memref<1x512xf32, #tpu.memory_space<vmem>>, vector<1x512xf32>
    %8 = vector.broadcast %7 : vector<1x512xf32> to vector<8x512xf32>
    %9 = arith.addf %6, %8 : vector<8x512xf32>
    %cst_10 = arith.constant 0.000000e+00 : f32
    %10 = vector.broadcast %cst_10 : f32 to vector<8x512xf32>
    %11 = arith.maximumf %9, %10 : vector<8x512xf32>
    %12 = arith.truncf %11 : vector<8x512xf32> to vector<8x512xbf16>
    %c0_11 = arith.constant 0 : index
    %c0_12 = arith.constant 0 : index
    %13 = vector.load %arg6[%c0_11, %c0_12] : memref<512x512xbf16, #tpu.memory_space<vmem>>, vector<512x512xbf16>
    %cst_13 = arith.constant dense<0.000000e+00> : vector<8x512xf32>
    %14 = tpu.matmul %12, %13, %cst_13 {dimension_numbers = #tpu.dot_dimension_numbers<[1], [0], [0], [1], [0, 0, 1, 1], [], []>} : vector<8x512xbf16>, vector<512x512xbf16>, vector<8x512xf32> -> vector<8x512xf32>
    %c0_14 = arith.constant 0 : index
    %c0_15 = arith.constant 0 : index
    %15 = vector.load %arg7[%c0_14, %c0_15] : memref<1x512xf32, #tpu.memory_space<vmem>>, vector<1x512xf32>
    %16 = vector.broadcast %15 : vector<1x512xf32> to vector<8x512xf32>
    %17 = arith.addf %14, %16 : vector<8x512xf32>
    %cst_16 = arith.constant 0.000000e+00 : f32
    %18 = vector.broadcast %cst_16 : f32 to vector<8x512xf32>
    %19 = arith.maximumf %17, %18 : vector<8x512xf32>
    %20 = arith.truncf %19 : vector<8x512xf32> to vector<8x512xbf16>
    %c0_17 = arith.constant 0 : index
    %c0_18 = arith.constant 0 : index
    %21 = vector.load %arg8[%c0_17, %c0_18] : memref<512x512xbf16, #tpu.memory_space<vmem>>, vector<512x512xbf16>
    %cst_19 = arith.constant dense<0.000000e+00> : vector<8x512xf32>
    %22 = tpu.matmul %20, %21, %cst_19 {dimension_numbers = #tpu.dot_dimension_numbers<[1], [0], [0], [1], [0, 0, 1, 1], [], []>} : vector<8x512xbf16>, vector<512x512xbf16>, vector<8x512xf32> -> vector<8x512xf32>
    %c0_20 = arith.constant 0 : index
    %c0_21 = arith.constant 0 : index
    %23 = vector.load %arg9[%c0_20, %c0_21] : memref<1x512xf32, #tpu.memory_space<vmem>>, vector<1x512xf32>
    %24 = vector.broadcast %23 : vector<1x512xf32> to vector<8x512xf32>
    %25 = arith.addf %22, %24 : vector<8x512xf32>
    %cst_22 = arith.constant 0.000000e+00 : f32
    %26 = vector.broadcast %cst_22 : f32 to vector<8x512xf32>
    %27 = arith.maximumf %25, %26 : vector<8x512xf32>
    %28 = arith.truncf %27 : vector<8x512xf32> to vector<8x512xbf16>
    %c0_23 = arith.constant 0 : index
    %c0_24 = arith.constant 0 : index
    %29 = vector.load %arg10[%c0_23, %c0_24] : memref<512x512xbf16, #tpu.memory_space<vmem>>, vector<512x512xbf16>
    %cst_25 = arith.constant dense<0.000000e+00> : vector<8x512xf32>
    %30 = tpu.matmul %28, %29, %cst_25 {dimension_numbers = #tpu.dot_dimension_numbers<[1], [0], [0], [1], [0, 0, 1, 1], [], []>} : vector<8x512xbf16>, vector<512x512xbf16>, vector<8x512xf32> -> vector<8x512xf32>
    %c0_26 = arith.constant 0 : index
    %c0_27 = arith.constant 0 : index
    %31 = vector.load %arg11[%c0_26, %c0_27] : memref<1x512xf32, #tpu.memory_space<vmem>>, vector<1x512xf32>
    %32 = vector.broadcast %31 : vector<1x512xf32> to vector<8x512xf32>
    %33 = arith.addf %30, %32 : vector<8x512xf32>
    %cst_28 = arith.constant 0.000000e+00 : f32
    %34 = vector.broadcast %cst_28 : f32 to vector<8x512xf32>
    %35 = arith.maximumf %33, %34 : vector<8x512xf32>
    %36 = arith.truncf %35 : vector<8x512xf32> to vector<8x512xbf16>
    %c0_29 = arith.constant 0 : index
    %c0_30 = arith.constant 0 : index
    %37 = vector.load %arg12[%c0_29, %c0_30] : memref<512x128xbf16, #tpu.memory_space<vmem>>, vector<512x128xbf16>
    %cst_31 = arith.constant dense<0.000000e+00> : vector<8x128xf32>
    %38 = tpu.matmul %36, %37, %cst_31 {dimension_numbers = #tpu.dot_dimension_numbers<[1], [0], [0], [1], [0, 0, 1, 1], [], []>} : vector<8x512xbf16>, vector<512x128xbf16>, vector<8x128xf32> -> vector<8x128xf32>
    %39 = vector.extract_strided_slice %38 {offsets = [0, 0], sizes = [8, 1], strides = [1, 1]} : vector<8x128xf32> to vector<8x1xf32>
    %c0_32 = arith.constant 0 : index
    %c0_33 = arith.constant 0 : index
    %40 = vector.load %arg13[%c0_32, %c0_33] : memref<1x1xf32, #tpu.memory_space<vmem>>, vector<1x1xf32>
    %41 = vector.broadcast %40 : vector<1x1xf32> to vector<8x1xf32>
    %42 = arith.addf %39, %41 : vector<8x1xf32>
    %43 = arith.negf %42 : vector<8x1xf32>
    %44 = math.exp %43 : vector<8x1xf32>
    %cst_34 = arith.constant 1.000000e+00 : f32
    %45 = vector.broadcast %cst_34 : f32 to vector<8x1xf32>
    %46 = arith.addf %45, %44 : vector<8x1xf32>
    %47 = arith.divf %45, %46 : vector<8x1xf32>
    %c0_35 = arith.constant 0 : index
    %c0_36 = arith.constant 0 : index
    %48 = vector.load %arg14[%c0_35, %c0_36] : memref<8x1xf32, #tpu.memory_space<vmem>>, vector<8x1xf32>
    tpu.vector_store %arg14[%c0_35, %c0_36], %47 {strides = array<i32>} : memref<8x1xf32, #tpu.memory_space<vmem>>, vector<8x1xf32>,
    return
  }
  func.func @transform_0(%arg0: i32) -> (i32, i32) {
    %c0_i32 = arith.constant 0 : i32
    %c0_i32_0 = arith.constant 0 : i32
    return %arg0, %c0_i32 : i32, i32
  }
  func.func @transform_1(%arg0: i32) -> (i32, i32) {
    %c0_i32 = arith.constant 0 : i32
    %c0_i32_0 = arith.constant 0 : i32
    return %arg0, %c0_i32 : i32, i32
  }
  func.func @transform_2(%arg0: i32) -> (i32, i32) {
    %c0_i32 = arith.constant 0 : i32
    %c0_i32_0 = arith.constant 0 : i32
    %c0_i32_1 = arith.constant 0 : i32
    return %c0_i32, %c0_i32_0 : i32, i32
  }
  func.func @transform_3(%arg0: i32) -> (i32, i32) {
    %c0_i32 = arith.constant 0 : i32
    %c0_i32_0 = arith.constant 0 : i32
    %c0_i32_1 = arith.constant 0 : i32
    return %c0_i32, %c0_i32_0 : i32, i32
  }
  func.func @transform_4(%arg0: i32) -> (i32, i32) {
    %c0_i32 = arith.constant 0 : i32
    %c0_i32_0 = arith.constant 0 : i32
    %c0_i32_1 = arith.constant 0 : i32
    return %c0_i32, %c0_i32_0 : i32, i32
  }
  func.func @transform_5(%arg0: i32) -> (i32, i32) {
    %c0_i32 = arith.constant 0 : i32
    %c0_i32_0 = arith.constant 0 : i32
    %c0_i32_1 = arith.constant 0 : i32
    return %c0_i32, %c0_i32_0 : i32, i32
  }
  func.func @transform_6(%arg0: i32) -> (i32, i32) {
    %c0_i32 = arith.constant 0 : i32
    %c0_i32_0 = arith.constant 0 : i32
    %c0_i32_1 = arith.constant 0 : i32
    return %c0_i32, %c0_i32_0 : i32, i32
  }
  func.func @transform_7(%arg0: i32) -> (i32, i32) {
    %c0_i32 = arith.constant 0 : i32
    %c0_i32_0 = arith.constant 0 : i32
    %c0_i32_1 = arith.constant 0 : i32
    return %c0_i32, %c0_i32_0 : i32, i32
  }
  func.func @transform_8(%arg0: i32) -> (i32, i32) {
    %c0_i32 = arith.constant 0 : i32
    %c0_i32_0 = arith.constant 0 : i32
    %c0_i32_1 = arith.constant 0 : i32
    return %c0_i32, %c0_i32_0 : i32, i32
  }
  func.func @transform_9(%arg0: i32) -> (i32, i32) {
    %c0_i32 = arith.constant 0 : i32
    %c0_i32_0 = arith.constant 0 : i32
    %c0_i32_1 = arith.constant 0 : i32
    return %c0_i32, %c0_i32_0 : i32, i32
  }
  func.func @transform_10(%arg0: i32) -> (i32, i32) {
    %c0_i32 = arith.constant 0 : i32
    %c0_i32_0 = arith.constant 0 : i32
    %c0_i32_1 = arith.constant 0 : i32
    return %c0_i32, %c0_i32_0 : i32, i32
  }
  func.func @transform_11(%arg0: i32) -> (i32, i32) {
    %c0_i32 = arith.constant 0 : i32
    %c0_i32_0 = arith.constant 0 : i32
    %c0_i32_1 = arith.constant 0 : i32
    return %c0_i32, %c0_i32_0 : i32, i32
  }
  func.func @transform_12(%arg0: i32) -> (i32, i32) {
    %c0_i32 = arith.constant 0 : i32
    %c0_i32_0 = arith.constant 0 : i32
    %c0_i32_1 = arith.constant 0 : i32
    return %c0_i32, %c0_i32_0 : i32, i32
  }
  func.func @transform_13(%arg0: i32) -> (i32, i32) {
    %c0_i32 = arith.constant 0 : i32
    %c0_i32_0 = arith.constant 0 : i32
    return %arg0, %c0_i32 : i32, i32
  }
}

</mosaic_0001>

<bundles_post_ra>
// kernel: tpu_custom_call.1
= control target key start
LH: loop header
LB: loop body
LE: loop exit
PB: predicated region body
PF: predicated region fallthrough
CT: control target
= control target key end

     0   :  { %s5145_s0 = inlined_call_operand.hbm [shape: bf16[8,16], index: 0, kind: input, shape index: {}]   ;;  %s5146_s1 = inlined_call_operand.hbm [shape: bf16[8,16], index: 1, kind: input, shape index: {}]   ;;  %s5147_s2 = inlined_call_operand.hbm [shape: bf16[16,512], index: 2, kind: input, shape index: {}]   ;;  %s5148_s3 = inlined_call_operand.hbm [shape: bf16[16,512], index: 3, kind: input, shape index: {}]   ;;  %s5149_s4 = inlined_call_operand.vmem [shape: f32[1,512], index: 4, kind: input, shape index: {}]   ;;  %s5150_s5 = inlined_call_operand.hbm [shape: bf16[512,512], index: 5, kind: input, shape index: {}]   ;;  %s5151_s6 = inlined_call_operand.vmem [shape: f32[1,512], index: 6, kind: input, shape index: {}]   ;;  %s5152_s7 = inlined_call_operand.hbm [shape: bf16[512,512], index: 7, kind: input, shape index: {}]   ;;  %s5153_s8 = inlined_call_operand.vmem [shape: f32[1,512], index: 8, kind: input, shape index: {}]   ;;  %s5154_s9 = inlined_call_operand.hbm [shape: bf16[512,512], index: 9, kind: input, shape index: {}]   ;;  %s5155_s10 = inlined_call_operand.vmem [shape: f32[1,512], index: 10, kind: input, shape index: {}]   ;;  %s5156_s11 = inlined_call_operand.hbm [shape: bf16[512,128], index: 11, kind: input, shape index: {}]   ;;  %s5157_s12 = inlined_call_operand.<no memory space> [shape: f32[1,1], index: 12, kind: input, shape index: {}]   ;;  %s5158_s13 = inlined_call_operand.vmem [shape: f32[8,1], index: 13, kind: output, shape index: {}]  }
   0x1   :  { %v18_v0 = vstv %s5157_s12 }
   0x2   :  { %19 = vst [vmem:[#allocation2] sm:$0x1] %v18_v0 }
   0x3   :  { %20 = vsyncpa [#allocation4], 0 }
   0x4   :  { %21 = vsyncpa [#allocation6], 0 }
   0x5   :  { %22 = vsyncpa [#allocation9], 0 }
   0x6   :  { %23 = vsyncpa [#allocation12], 0 }
   0x7   :  { %24 = vsyncpa [#allocation15], 0  ;;  %s4935_s27 = smov [#allocation5]  }
   0x8   :  { %s41_s28 = sshll.u32 %s4935_s27, 4  ;;  %s42_s28 = int_to_ptr.vmem [resolvable:$true] %s41_s28 }
   0x9   :  { %s4773_s29 = scalar_lea.vmem %s42_s28, 64  ;;  %p4778_p1 = scmp.lt.s32.totalorder %s42_s28, %s42_s28 }
   0xa   :  { %p4774_p0 = scmp.ne.s32.totalorder %s42_s28, %s4773_s29  ;;  %p4779_p2 = scmp.lt.s32.totalorder %s4773_s29, %s4773_s29 }
   0xc   :  { %p4780_p3 = por %p4779_p2, %p4778_p1 }
   0xe   :  { %p4781_p4 = pnand %p4780_p3, %p4774_p0 }
  0x10   :  { %4784 = shalt.err (!%p4781_p4)
}
  0x11   :  { %44 = dma.hbm_to_vmem [thread:$0]  %s5146_s1, 64, %s42_s28, [#allocation6]  }
  0x12   :  { %s4936_s12 = smov [#allocation8]   ;;  %s4937_s16 = smov [#allocation11]  }
  0x13   :  { %s62_s15 = sshll.u32 %s4936_s12, 4  ;;  %s90_s17 = sshll.u32 %s4937_s16, 4  ;;  %s63_s15 = int_to_ptr.vmem [resolvable:$true] %s62_s15  ;;  %s91_s17 = int_to_ptr.vmem [resolvable:$true] %s90_s17 }
  0x14   :  { %s4793_s18 = scalar_lea.vmem %s63_s15, 512  ;;  %p4798_p6 = scmp.lt.s32.totalorder %s63_s15, %s63_s15 }
  0x15   :  { %p4794_p5 = scmp.ne.s32.totalorder %s63_s15, %s4793_s18  ;;  %p4799_p7 = scmp.lt.s32.totalorder %s4793_s18, %s4793_s18 }
  0x17   :  { %p4800_p8 = por %p4799_p7, %p4798_p6 }
  0x19   :  { %p4801_p9 = pnand %p4800_p8, %p4794_p5 }
  0x1b   :  { %4804 = shalt.err (!%p4801_p9)
}
  0x1c   :  { %s4938_s19 = smov 256   ;;  %s4939_s20 = smov 16  }
  0x1d   :  { %68 = dma.hbm_to_vmem [thread:$0]  %s5148_s3, 512, %s63_s15, [#allocation9], %s4938_s19, %s4938_s19, %s4939_s20  }
  0x1e   :  { %s4813_s1 = scalar_lea.vmem %s91_s17, 16384  ;;  %p4818_p11 = scmp.lt.s32.totalorder %s91_s17, %s91_s17 }
  0x1f   :  { %p4814_p10 = scmp.ne.s32.totalorder %s91_s17, %s4813_s1  ;;  %p4819_p12 = scmp.lt.s32.totalorder %s4813_s1, %s4813_s1 }
  0x21   :  { %p4820_p13 = por %p4819_p12, %p4818_p11 }
  0x23   :  { %p4821_p0 = pnand %p4820_p13, %p4814_p10 }
  0x25   :  { %4824 = shalt.err (!%p4821_p0)
}
  0x26   :  { %96 = dma.hbm_to_vmem [thread:$0]  %s5152_s7, 16384, %s91_s17, [#allocation12], %s4938_s19, %s4938_s19, %s4939_s20  }
  0x27   :  { %s4940_s25 = smov [#allocation3]   ;;  %s4941_s27 = smov [#allocation7]  }
  0x28   :  { %s31_s26 = sshll.u32 %s4940_s25, 4  ;;  %s50_s3 = sshll.u32 %s4941_s27, 4  ;;  %s32_s26 = int_to_ptr.vmem [resolvable:$true] %s31_s26  ;;  %s51_s3 = int_to_ptr.vmem [resolvable:$true] %s50_s3 }
  0x29   :  { %s4833_s28 = scalar_lea.vmem %s32_s26, 64  ;;  %p4838_p2 = scmp.lt.s32.totalorder %s32_s26, %s32_s26 }
  0x2a   :  { %p4834_p1 = scmp.ne.s32.totalorder %s32_s26, %s4833_s28  ;;  %p4839_p3 = scmp.lt.s32.totalorder %s4833_s28, %s4833_s28 }
  0x2c   :  { %p4840_p4 = por %p4839_p3, %p4838_p2 }
  0x2e   :  { %p4841_p5 = pnand %p4840_p4, %p4834_p1 }
  0x30   :  { %4844 = shalt.err (!%p4841_p5)
}
  0x31   :  { %34 = dma.hbm_to_vmem [thread:$0]  %s5145_s0, 64, %s32_s26, [#allocation4]  }
  0x32   :  { %s4853_s14 = scalar_lea.vmem %s51_s3, 512  ;;  %p4858_p7 = scmp.lt.s32.totalorder %s51_s3, %s51_s3 }
  0x33   :  { %p4854_p6 = scmp.ne.s32.totalorder %s51_s3, %s4853_s14  ;;  %p4859_p8 = scmp.lt.s32.totalorder %s4853_s14, %s4853_s14 }
  0x35   :  { %p4860_p9 = por %p4859_p8, %p4858_p7 }
  0x37   :  { %p4861_p10 = pnand %p4860_p9, %p4854_p6 }
  0x39   :  { %4864 = shalt.err (!%p4861_p10)
}
  0x3a   :  { %56 = dma.hbm_to_vmem [thread:$0]  %s5147_s2, 512, %s51_s3, [#allocation6], %s4938_s19, %s4938_s19, %s4939_s20  }
  0x3b   :  { %s4942_s15 = smov [#allocation10]   ;;  %s4943_s17 = smov [#allocation13]  }
  0x3c   :  { %s76_s16 = sshll.u32 %s4942_s15, 4  ;;  %s104_s0 = sshll.u32 %s4943_s17, 4  ;;  %s77_s16 = int_to_ptr.vmem [resolvable:$true] %s76_s16  ;;  %s105_s0 = int_to_ptr.vmem [resolvable:$true] %s104_s0 }
  0x3d   :  { %s4873_s18 = scalar_lea.vmem %s77_s16, 16384  ;;  %p4878_p12 = scmp.lt.s32.totalorder %s77_s16, %s77_s16 }
  0x3e   :  { %p4874_p11 = scmp.ne.s32.totalorder %s77_s16, %s4873_s18  ;;  %p4879_p13 = scmp.lt.s32.totalorder %s4873_s18, %s4873_s18 }
  0x40   :  { %p4880_p0 = por %p4879_p13, %p4878_p12 }
  0x42   :  { %p4881_p1 = pnand %p4880_p0, %p4874_p11 }
  0x44   :  { %4884 = shalt.err (!%p4881_p1)
}
  0x45   :  { %82 = dma.hbm_to_vmem [thread:$0]  %s5150_s5, 16384, %s77_s16, [#allocation9], %s4938_s19, %s4938_s19, %s4939_s20  }
  0x46   :  { %s4893_s2 = scalar_lea.vmem %s105_s0, 16384  ;;  %p4898_p3 = scmp.lt.s32.totalorder %s105_s0, %s105_s0 }
  0x47   :  { %p4894_p2 = scmp.ne.s32.totalorder %s105_s0, %s4893_s2  ;;  %p4899_p4 = scmp.lt.s32.totalorder %s4893_s2, %s4893_s2 }
  0x49   :  { %p4900_p5 = por %p4899_p4, %p4898_p3 }
  0x4b   :  { %p4901_p6 = pnand %p4900_p5, %p4894_p2 }
  0x4d   :  { %4904 = shalt.err (!%p4901_p6)
}
  0x4e   :  { %110 = dma.hbm_to_vmem [thread:$0]  %s5154_s9, 16384, %s105_s0, [#allocation12], %s4938_s19, %s4938_s19, %s4939_s20  }
  0x4f   :  { %s4944_s24 = smov [#allocation14]  }
  0x50   :  { %s118_s25 = sshll.u32 %s4944_s24, 4  ;;  %s119_s25 = int_to_ptr.vmem [resolvable:$true] %s118_s25 }
  0x51   :  { %s4913_s26 = scalar_lea.vmem %s119_s25, 4096  ;;  %p4918_p8 = scmp.lt.s32.totalorder %s119_s25, %s119_s25 }
  0x52   :  { %p4914_p7 = scmp.ne.s32.totalorder %s119_s25, %s4913_s26  ;;  %p4919_p9 = scmp.lt.s32.totalorder %s4913_s26, %s4913_s26 }
  0x54   :  { %p4920_p10 = por %p4919_p9, %p4918_p8 }
  0x56   :  { %p4921_p11 = pnand %p4920_p10, %p4914_p7 }
  0x58   :  { %4924 = shalt.err (!%p4921_p11)
}
  0x59   :  { %s4945_s5 = smov 64   ;;  %s4946_s27 = smov 4  }
  0x5a   :  { %124 = dma.hbm_to_vmem [thread:$0]  %s5156_s11, 4096, %s119_s25, [#allocation15], %s4945_s5, %s4945_s5, %s4946_s27  }
  0x5b   :  { %4925 = dma.done.wait [#allocation4], 64  }
  0x5c   :  { %4926 = vsyncadd [#allocation4], 4294967232 }
  0x5d   :  { %4927 = dma.done.wait [#allocation6], 576  }
  0x5e   :  { %4928 = vsyncadd [#allocation6], 4294966720 }
  0x5f   :  { %4929 = dma.done.wait [#allocation9], 16896  }
  0x60   :  { %4930 = vsyncadd [#allocation9], 4294950400 }
  0x61   :  { %4931 = dma.done.wait [#allocation12], 32768  }
  0x62   :  { %4932 = vsyncadd [#allocation12], 4294934528 }
  0x63   :  { %4933 = dma.done.wait [#allocation15], 4096  }
  0x64   :  { %4934 = vsyncadd [#allocation15], 4294963200  ;;  %v4947_v1 = vmov 0   ;;  %v4141_v2 = vld [vmem:[#allocation8 + $0x4] ss:$16 sps:$4 sm:$0xff]   ;;  %vm182_vm0 = vcmask 130048  }
  0x65   :  { %218 = vmatprep.mubr.bf16.mxu0 %v4947_v1  ;;  %259 = vmatprep.mubr.bf16.mxu1 %v4947_v1  ;;  %v4143_v3 = vld [vmem:[#allocation8 + $0xc] ss:$16 sps:$4 sm:$0xff]   ;;  %v4145_v4 = vld [vmem:[#allocation8] ss:$16 sps:$4 sm:$0xff]   ;;  %v4146_v5 = vld [vmem:[#allocation8 + $0x8] ss:$16 sps:$4 sm:$0xff]  }
  0x66   :  { %200 = vmatprep.subr.bf16.mxu0 %v4141_v2  ;;  %v157_v6 = vld [vmem:[#allocation5] sm:$0xf]  ;;  %241 = vmatprep.subr.bf16.mxu1 %v4143_v3  ;;  %v4147_v7 = vld [vmem:[#allocation7] ss:$16 sps:$4 sm:$0xff]   ;;  %v4149_v8 = vld [vmem:[#allocation7 + $0x4] ss:$16 sps:$4 sm:$0xff]  }
  0x67   :  { %201 = vmatpush1.bf16.msra.mxu0 %v4145_v4  ;;  %242 = vmatpush1.bf16.msra.mxu1 %v4146_v5  ;;  %v4150_v9 = vld [vmem:[#allocation7 + $0x8] ss:$16 sps:$4 sm:$0xff]   ;;  %v4152_v10 = vld [vmem:[#allocation7 + $0xc] ss:$16 sps:$4 sm:$0xff]   ;;  %v4155_v11 = vld [vmem:[#allocation10 + $0xe4] ss:$16 sps:$4 sm:$0xff]  }
  0x68   :  { %305 = vmatprep.subr.bf16.mxu0 %v4149_v8  ;;  %346 = vmatprep.subr.bf16.mxu1 %v4152_v10  ;;  %v4158_v12 = vld [vmem:[#allocation10 + $0x2e4] ss:$16 sps:$4 sm:$0xff]   ;;  %v152_v13 = vld [vmem:[#allocation3] sm:$0xf]  ;;  %v4153_v14 = vld [vmem:[#allocation10 + $0xe0] ss:$16 sps:$4 sm:$0xff]  }
  0x69   :  { %v4156_v15 = vld [vmem:[#allocation10 + $0x2e0] ss:$16 sps:$4 sm:$0xff]   ;;  %v4161_v16 = vld [vmem:[#allocation10 + $0xc4] ss:$16 sps:$4 sm:$0xff]   ;;  %vm3643_vm1 = vcmask 7168  }
  0x6a   :  { %3658 = vmatmul.mubr.msk.bf16.vlgmr.msra.gmra.mxu0 %vm182_vm0, %v157_v6  ;;  %3659 = vmatmul.mubr.msk.bf16.vlgmr.msra.gmra.mxu1 %vm182_vm0, %v157_v6  ;;  %v4164_v17 = vld [vmem:[#allocation10 + $0x2c4] ss:$16 sps:$4 sm:$0xff]   ;;  %v4159_v18 = vld [vmem:[#allocation10 + $0xc0] ss:$16 sps:$4 sm:$0xff]  }
  0x6b   :  { %306 = vmatpush1.bf16.msra.mxu0 %v4147_v7  ;;  %347 = vmatpush1.bf16.msra.mxu1 %v4150_v9  ;;  %v4162_v19 = vld [vmem:[#allocation10 + $0x2c0] ss:$16 sps:$4 sm:$0xff]   ;;  %v4167_v20 = vld [vmem:[#allocation10 + $0xa4] ss:$16 sps:$4 sm:$0xff]  }
  0x6c   :  { %323 = vmatprep.mubr.bf16.mxu0 %v4947_v1  ;;  %364 = vmatprep.mubr.bf16.mxu1 %v4947_v1  ;;  %v4170_v21 = vld [vmem:[#allocation10 + $0x2a4] ss:$16 sps:$4 sm:$0xff]   ;;  %v4165_v22 = vld [vmem:[#allocation10 + $0xa0] ss:$16 sps:$4 sm:$0xff]  }
  0x6d   :  { %1197 = vmatprep.subr.bf16.mxu0 %v4155_v11  ;;  %1238 = vmatprep.subr.bf16.mxu1 %v4158_v12  ;;  %v4168_v23 = vld [vmem:[#allocation10 + $0x2a0] ss:$16 sps:$4 sm:$0xff]   ;;  %v4173_v24 = vld [vmem:[#allocation10 + $0x84] ss:$16 sps:$4 sm:$0xff]   ;;  %v4251_v12 = vld [vmem:[#allocation10 + $0xec] ss:$16 sps:$4 sm:$0xff]  }
  0x6e   :  { %v4176_v25 = vld [vmem:[#allocation10 + $0x284] ss:$16 sps:$4 sm:$0xff]   ;;  %v4171_v26 = vld [vmem:[#allocation10 + $0x80] ss:$16 sps:$4 sm:$0xff]  }
  0x6f   :  { %v4174_v27 = vld [vmem:[#allocation10 + $0x280] ss:$16 sps:$4 sm:$0xff]   ;;  %v4179_v28 = vld [vmem:[#allocation10 + $0x64] ss:$16 sps:$4 sm:$0xff]  }
  0x70   :  { %v4182_v29 = vld [vmem:[#allocation10 + $0x264] ss:$16 sps:$4 sm:$0xff]   ;;  %v4177_v30 = vld [vmem:[#allocation10 + $0x60] ss:$16 sps:$4 sm:$0xff]  }
  0x71   :  { %v4180_v31 = vld [vmem:[#allocation10 + $0x260] ss:$16 sps:$4 sm:$0xff]   ;;  %v4185_v32 = vld [vmem:[#allocation10 + $0x44] ss:$16 sps:$4 sm:$0xff]  }
  0x72   :  { %3664 = vmatmul.mubr.msk.bf16.vlgmr.msra.gmra.mxu0 %vm182_vm0, %v152_v13  ;;  %3665 = vmatmul.mubr.msk.bf16.vlgmr.msra.gmra.mxu1 %vm182_vm0, %v152_v13  ;;  %v4188_v33 = vld [vmem:[#allocation10 + $0x244] ss:$16 sps:$4 sm:$0xff]   ;;  %v4183_v34 = vld [vmem:[#allocation10 + $0x40] ss:$16 sps:$4 sm:$0xff]   ;;  %v4254_v13 = vld [vmem:[#allocation10 + $0x2ec] ss:$16 sps:$4 sm:$0xff]  }
  0x73   :  { %1198 = vmatpush1.bf16.msra.mxu0 %v4153_v14  ;;  %1239 = vmatpush1.bf16.msra.mxu1 %v4156_v15  ;;  %v4186_v35 = vld [vmem:[#allocation10 + $0x240] ss:$16 sps:$4 sm:$0xff]   ;;  %v4191_v36 = vld [vmem:[#allocation10 + $0x24] ss:$16 sps:$4 sm:$0xff]   ;;  %v375_v14 = vlaneseq }
  0x74   :  { %1199 = vmatprep.subr.bf16.mxu0 %v4161_v16  ;;  %1240 = vmatprep.subr.bf16.mxu1 %v4164_v17  ;;  %v4194_v37 = vld [vmem:[#allocation10 + $0x224] ss:$16 sps:$4 sm:$0xff]   ;;  %v4189_v38 = vld [vmem:[#allocation10 + $0x20] ss:$16 sps:$4 sm:$0xff]  }
  0x75   :  { %v4192_v39 = vld [vmem:[#allocation10 + $0x220] ss:$16 sps:$4 sm:$0xff]   ;;  %v4197_v40 = vld [vmem:[#allocation10 + $0x4] ss:$16 sps:$4 sm:$0xff]   ;;  %v376_v15 = vshrl.u32 %v375_v14, 7 }
  0x76   :  { %v4200_v41 = vld [vmem:[#allocation10 + $0x204] ss:$16 sps:$4 sm:$0xff]   ;;  %v4195_v42 = vld [vmem:[#allocation10] ss:$16 sps:$4 sm:$0xff]   ;;  %v4282_v14 = vld [vmem:[#allocation10 + $0x248] ss:$16 sps:$4 sm:$0xff]  }
  0x77   :  { %1200 = vmatpush1.bf16.msra.mxu0 %v4159_v18  ;;  %1241 = vmatpush1.bf16.msra.mxu1 %v4162_v19  ;;  %v4198_v43 = vld [vmem:[#allocation10 + $0x200] ss:$16 sps:$4 sm:$0xff]   ;;  %v4203_v44 = vld [vmem:[#allocation10 + $0x1e4] ss:$16 sps:$4 sm:$0xff]   ;;  %v5064_v18 = vsub.s32 0, %v376_v15  ;;  %v5066_v19 = vsub.s32 2, %v376_v15 }
  0x78   :  { %1201 = vmatprep.subr.bf16.mxu0 %v4167_v20  ;;  %1242 = vmatprep.subr.bf16.mxu1 %v4170_v21  ;;  %v4206_v45 = vld [vmem:[#allocation10 + $0x3e4] ss:$16 sps:$4 sm:$0xff]   ;;  %v4201_v46 = vld [vmem:[#allocation10 + $0x1e0] ss:$16 sps:$4 sm:$0xff]  }
  0x79   :  { %v4204_v47 = vld [vmem:[#allocation10 + $0x3e0] ss:$16 sps:$4 sm:$0xff]   ;;  %v4209_v48 = vld [vmem:[#allocation10 + $0x1c4] ss:$16 sps:$4 sm:$0xff]  }
  0x7a   :  { %v4212_v49 = vld [vmem:[#allocation10 + $0x3c4] ss:$16 sps:$4 sm:$0xff]   ;;  %v4207_v50 = vld [vmem:[#allocation10 + $0x1c0] ss:$16 sps:$4 sm:$0xff]  }
  0x7b   :  { %1202 = vmatpush1.bf16.msra.mxu0 %v4165_v22  ;;  %1243 = vmatpush1.bf16.msra.mxu1 %v4168_v23  ;;  %v4210_v51 = vld [vmem:[#allocation10 + $0x3c0] ss:$16 sps:$4 sm:$0xff]   ;;  %v4215_v52 = vld [vmem:[#allocation10 + $0x1a4] ss:$16 sps:$4 sm:$0xff]  }
  0x7c   :  { %1203 = vmatprep.subr.bf16.mxu0 %v4173_v24  ;;  %1244 = vmatprep.subr.bf16.mxu1 %v4176_v25  ;;  %v4218_v53 = vld [vmem:[#allocation10 + $0x3a4] ss:$16 sps:$4 sm:$0xff]   ;;  %v4213_v54 = vld [vmem:[#allocation10 + $0x1a0] ss:$16 sps:$4 sm:$0xff]   ;;  %v5071_v25 = vsub.s32 1, %v376_v15 }
  0x7d   :  { %v4216_v55 = vld [vmem:[#allocation10 + $0x3a0] ss:$16 sps:$4 sm:$0xff]   ;;  %v4221_v56 = vld [vmem:[#allocation10 + $0x184] ss:$16 sps:$4 sm:$0xff]  }
  0x7e   :  { %v4224_v57 = vld [vmem:[#allocation10 + $0x384] ss:$16 sps:$4 sm:$0xff]   ;;  %v4219_v58 = vld [vmem:[#allocation10 + $0x180] ss:$16 sps:$4 sm:$0xff]  }
  0x7f   :  { %1204 = vmatpush1.bf16.msra.mxu0 %v4171_v26  ;;  %1245 = vmatpush1.bf16.msra.mxu1 %v4174_v27  ;;  %v4222_v59 = vld [vmem:[#allocation10 + $0x380] ss:$16 sps:$4 sm:$0xff]   ;;  %v4227_v60 = vld [vmem:[#allocation10 + $0x164] ss:$16 sps:$4 sm:$0xff]   ;;  %v5073_v26 = vsub.s32 3, %v376_v15 }
  0x80   :  { %1205 = vmatprep.subr.bf16.mxu0 %v4179_v28  ;;  %1246 = vmatprep.subr.bf16.mxu1 %v4182_v29  ;;  %v4230_v61 = vld [vmem:[#allocation10 + $0x364] ss:$16 sps:$4 sm:$0xff]   ;;  %v4225_v62 = vld [vmem:[#allocation10 + $0x160] ss:$16 sps:$4 sm:$0xff]   ;;  %v4287_v15 = vld [vmem:[#allocation10 + $0x2c] ss:$16 sps:$4 sm:$0xff]  }
  0x81   :  { %v4228_v63 = vld [vmem:[#allocation10 + $0x360] ss:$16 sps:$4 sm:$0xff]   ;;  %v4233_v0 = vld [vmem:[#allocation10 + $0x144] ss:$16 sps:$4 sm:$0xff]  }
  0x82   :  { %v4236_v1 = vld [vmem:[#allocation10 + $0x344] ss:$16 sps:$4 sm:$0xff]   ;;  %v4231_v2 = vld [vmem:[#allocation10 + $0x140] ss:$16 sps:$4 sm:$0xff]  }
  0x83   :  { %1206 = vmatpush1.bf16.msra.mxu0 %v4177_v30  ;;  %1247 = vmatpush1.bf16.msra.mxu1 %v4180_v31  ;;  %v4234_v3 = vld [vmem:[#allocation10 + $0x340] ss:$16 sps:$4 sm:$0xff]   ;;  %v4239_v4 = vld [vmem:[#allocation10 + $0x124] ss:$16 sps:$4 sm:$0xff]  }
  0x84   :  { %1207 = vmatprep.subr.bf16.mxu0 %v4185_v32  ;;  %1248 = vmatprep.subr.bf16.mxu1 %v4188_v33  ;;  %v4242_v5 = vld [vmem:[#allocation10 + $0x324] ss:$16 sps:$4 sm:$0xff]   ;;  %v4237_v6 = vld [vmem:[#allocation10 + $0x120] ss:$16 sps:$4 sm:$0xff]  }
  0x85   :  { %v4240_v7 = vld [vmem:[#allocation10 + $0x320] ss:$16 sps:$4 sm:$0xff]   ;;  %v4245_v8 = vld [vmem:[#allocation10 + $0x104] ss:$16 sps:$4 sm:$0xff]  }
  0x86   :  { %v4248_v9 = vld [vmem:[#allocation10 + $0x304] ss:$16 sps:$4 sm:$0xff]   ;;  %v4243_v10 = vld [vmem:[#allocation10 + $0x100] ss:$16 sps:$4 sm:$0xff]  }
  0x87   :  { %1208 = vmatpush1.bf16.msra.mxu0 %v4183_v34  ;;  %1249 = vmatpush1.bf16.msra.mxu1 %v4186_v35  ;;  %v4246_v11 = vld [vmem:[#allocation10 + $0x300] ss:$16 sps:$4 sm:$0xff]   ;;  %v373_v22 = vld [vmem:[%s5149_s4] sm:$0xf] }
  0x88   :  { %1209 = vmatprep.subr.bf16.mxu0 %v4191_v36  ;;  %1250 = vmatprep.subr.bf16.mxu1 %v4194_v37  ;;  %v378_v29 = vrot.slane %v373_v22, %v5064_v18  ;;  %v386_v30 = vrot.slane %v373_v22, %v5066_v19  ;;  %v382_v35 = vrot.slane %v373_v22, %v5071_v25 }
  0x89   :  { %v390_v36 = vrot.slane %v373_v22, %v5073_v26  ;;  %v4296_v22 = vld [vmem:[#allocation10 + $0x20c] ss:$16 sps:$4 sm:$0xff]  }
  0x8b   :  { %1210 = vmatpush1.bf16.msra.mxu0 %v4189_v38  ;;  %1251 = vmatpush1.bf16.msra.mxu1 %v4192_v39 }
  0x8c   :  { %1211 = vmatprep.subr.bf16.mxu0 %v4197_v40  ;;  %1252 = vmatprep.subr.bf16.mxu1 %v4200_v41 }
  0x8f   :  { %1212 = vmatpush1.bf16.msra.mxu0 %v4195_v42  ;;  %1253 = vmatpush1.bf16.msra.mxu1 %v4198_v43 }
  0x90   :  { %1213 = vmatprep.subr.bf16.mxu0 %v4203_v44  ;;  %1254 = vmatprep.subr.bf16.mxu1 %v4206_v45 }
  0x93   :  { %1214 = vmatpush2.bf16.msra.mxu0 %v4201_v46  ;;  %1255 = vmatpush2.bf16.msra.mxu1 %v4204_v47 }
  0x94   :  { %1215 = vmatprep.subr.bf16.mxu0 %v4209_v48  ;;  %1256 = vmatprep.subr.bf16.mxu1 %v4212_v49 }
  0x97   :  { %1216 = vmatpush2.bf16.msra.mxu0 %v4207_v50  ;;  %1257 = vmatpush2.bf16.msra.mxu1 %v4210_v51 }
  0x98   :  { %1217 = vmatprep.subr.bf16.mxu0 %v4215_v52  ;;  %1258 = vmatprep.subr.bf16.mxu1 %v4218_v53 }
  0x9b   :  { %1218 = vmatpush2.bf16.msra.mxu0 %v4213_v54  ;;  %1259 = vmatpush2.bf16.msra.mxu1 %v4216_v55  ;;  %v4249_v55 = vld [vmem:[#allocation10 + $0xe8] ss:$16 sps:$4 sm:$0xff]  }
  0x9c   :  { %1219 = vmatprep.subr.bf16.mxu0 %v4221_v56  ;;  %1260 = vmatprep.subr.bf16.mxu1 %v4224_v57  ;;  %v4252_v56 = vld [vmem:[#allocation10 + $0x2e8] ss:$16 sps:$4 sm:$0xff]  }
  0x9f   :  { %1220 = vmatpush2.bf16.msra.mxu0 %v4219_v58  ;;  %1261 = vmatpush2.bf16.msra.mxu1 %v4222_v59  ;;  %v4257_v59 = vld [vmem:[#allocation10 + $0xcc] ss:$16 sps:$4 sm:$0xff]  }
  0xa0   :  { %1221 = vmatprep.subr.bf16.mxu0 %v4227_v60  ;;  %1262 = vmatprep.subr.bf16.mxu1 %v4230_v61  ;;  %v4260_v60 = vld [vmem:[#allocation10 + $0x2cc] ss:$16 sps:$4 sm:$0xff]   ;;  %v4255_v61 = vld [vmem:[#allocation10 + $0xc8] ss:$16 sps:$4 sm:$0xff]  }
  0xa3   :  { %1222 = vmatpush2.bf16.msra.mxu0 %v4225_v62  ;;  %1263 = vmatpush2.bf16.msra.mxu1 %v4228_v63  ;;  %v4258_v62 = vld [vmem:[#allocation10 + $0x2c8] ss:$16 sps:$4 sm:$0xff]   ;;  %v4263_v63 = vld [vmem:[#allocation10 + $0xac] ss:$16 sps:$4 sm:$0xff]  }
  0xa4   :  { %1223 = vmatprep.subr.bf16.mxu0 %v4233_v0  ;;  %1264 = vmatprep.subr.bf16.mxu1 %v4236_v1  ;;  %v4266_v0 = vld [vmem:[#allocation10 + $0x2ac] ss:$16 sps:$4 sm:$0xff]   ;;  %v4261_v1 = vld [vmem:[#allocation10 + $0xa8] ss:$16 sps:$4 sm:$0xff]  }
  0xa7   :  { %1224 = vmatpush2.bf16.msra.mxu0 %v4231_v2  ;;  %1265 = vmatpush2.bf16.msra.mxu1 %v4234_v3  ;;  %v4264_v2 = vld [vmem:[#allocation10 + $0x2a8] ss:$16 sps:$4 sm:$0xff]   ;;  %v4269_v3 = vld [vmem:[#allocation10 + $0x8c] ss:$16 sps:$4 sm:$0xff]  }
  0xa8   :  { %1225 = vmatprep.subr.bf16.mxu0 %v4239_v4  ;;  %1266 = vmatprep.subr.bf16.mxu1 %v4242_v5  ;;  %v4272_v4 = vld [vmem:[#allocation10 + $0x28c] ss:$16 sps:$4 sm:$0xff]   ;;  %v4267_v5 = vld [vmem:[#allocation10 + $0x88] ss:$16 sps:$4 sm:$0xff]  }
  0xab   :  { %1226 = vmatpush2.bf16.msra.mxu0 %v4237_v6  ;;  %1267 = vmatpush2.bf16.msra.mxu1 %v4240_v7  ;;  %v4270_v6 = vld [vmem:[#allocation10 + $0x288] ss:$16 sps:$4 sm:$0xff]   ;;  %v4275_v7 = vld [vmem:[#allocation10 + $0x6c] ss:$16 sps:$4 sm:$0xff]  }
  0xac   :  { %1227 = vmatprep.subr.bf16.mxu0 %v4245_v8  ;;  %1268 = vmatprep.subr.bf16.mxu1 %v4248_v9  ;;  %v4278_v8 = vld [vmem:[#allocation10 + $0x26c] ss:$16 sps:$4 sm:$0xff]   ;;  %v4273_v9 = vld [vmem:[#allocation10 + $0x68] ss:$16 sps:$4 sm:$0xff]  }
  0xaf   :  { %1228 = vmatpush2.bf16.msra.mxu0 %v4243_v10  ;;  %1269 = vmatpush2.bf16.msra.mxu1 %v4246_v11  ;;  %v4276_v10 = vld [vmem:[#allocation10 + $0x268] ss:$16 sps:$4 sm:$0xff]   ;;  %v4281_v11 = vld [vmem:[#allocation10 + $0x4c] ss:$16 sps:$4 sm:$0xff]  }
  0xb0   :  { %1279 = vmatprep.subr.bf16.mxu0 %v4251_v12  ;;  %1320 = vmatprep.subr.bf16.mxu1 %v4254_v13  ;;  %v4284_v12 = vld [vmem:[#allocation10 + $0x24c] ss:$16 sps:$4 sm:$0xff]   ;;  %v4279_v13 = vld [vmem:[#allocation10 + $0x48] ss:$16 sps:$4 sm:$0xff]  }
 0x12a   :  { %v220_v16 = vpop.f32.mrf.mxu0  ;;  %v261_v17 = vpop.f32.mrf.mxu1 }
 0x12c   :  { %v222_v20 = vpop.f32.mrf.mxu0  ;;  %v263_v21 = vpop.f32.mrf.mxu1 }
 0x12e   :  { %v224_v23 = vpop.f32.mrf.mxu0  ;;  %v265_v24 = vpop.f32.mrf.mxu1 }
 0x12f   :  { %v4291_v23 = vld [vmem:[#allocation10 + $0x8] ss:$16 sps:$4 sm:$0xff]  }
 0x130   :  { %v225_v27 = vpop.f32.mrf.mxu0  ;;  %v266_v28 = vpop.f32.mrf.mxu1  ;;  %v4294_v24 = vld [vmem:[#allocation10 + $0x208] ss:$16 sps:$4 sm:$0xff]  }
 0x131   :  { %v4299_v27 = vld [vmem:[#allocation10 + $0x1ec] ss:$16 sps:$4 sm:$0xff]  }
 0x132   :  { %v325_v31 = vpop.f32.mrf.mxu0  ;;  %v366_v32 = vpop.f32.mrf.mxu1  ;;  %v4302_v28 = vld [vmem:[#allocation10 + $0x3ec] ss:$16 sps:$4 sm:$0xff]  }
 0x133   :  { %v326_v33 = vadd.f32 %v325_v31, %v220_v16  ;;  %v367_v34 = vadd.f32 %v366_v32, %v261_v17  ;;  %v4290_v16 = vld [vmem:[#allocation10 + $0x22c] ss:$16 sps:$4 sm:$0xff]   ;;  %v4285_v17 = vld [vmem:[#allocation10 + $0x28] ss:$16 sps:$4 sm:$0xff]  }
 0x134   :  { %v327_v37 = vpop.f32.mrf.mxu0  ;;  %v368_v38 = vpop.f32.mrf.mxu1  ;;  %v4305_v31 = vld [vmem:[#allocation10 + $0x1cc] ss:$16 sps:$4 sm:$0xff]  }
 0x135   :  { %v395_v39 = vadd.f32 %v378_v29, %v326_v33  ;;  %v397_v40 = vadd.f32 %v386_v30, %v367_v34  ;;  %v328_v41 = vadd.f32 %v327_v37, %v222_v20  ;;  %v369_v42 = vadd.f32 %v368_v38, %v263_v21  ;;  %v4288_v20 = vld [vmem:[#allocation10 + $0x228] ss:$16 sps:$4 sm:$0xff]   ;;  %v4293_v21 = vld [vmem:[#allocation10 + $0xc] ss:$16 sps:$4 sm:$0xff]  }
 0x136   :  { %v329_v43 = vpop.f32.mrf.mxu0  ;;  %v370_v44 = vpop.f32.mrf.mxu1  ;;  %v4297_v29 = vld [vmem:[#allocation10 + $0x1e8] ss:$16 sps:$4 sm:$0xff]   ;;  %v4308_v32 = vld [vmem:[#allocation10 + $0x3cc] ss:$16 sps:$4 sm:$0xff]  }
 0x137   :  { %v396_v45 = vadd.f32 %v382_v35, %v328_v41  ;;  %v398_v46 = vadd.f32 %v390_v36, %v369_v42  ;;  %v399_v47 = vmax.f32 %v395_v39, 0.0  ;;  %v401_v48 = vmax.f32 %v397_v40, 0.0  ;;  %v4300_v30 = vld [vmem:[#allocation10 + $0x3e8] ss:$16 sps:$4 sm:$0xff]   ;;  %v4311_v35 = vld [vmem:[#allocation10 + $0x1ac] ss:$16 sps:$4 sm:$0xff]  }
 0x138   :  { %v330_v49 = vpop.f32.mrf.mxu0  ;;  %v371_v50 = vpop.f32.mrf.mxu1  ;;  %v4303_v33 = vld [vmem:[#allocation10 + $0x1c8] ss:$16 sps:$4 sm:$0xff]   ;;  %v4314_v36 = vld [vmem:[#allocation10 + $0x3ac] ss:$16 sps:$4 sm:$0xff]  }
 0x139   :  { %v400_v51 = vmax.f32 %v396_v45, 0.0  ;;  %v402_v52 = vmax.f32 %v398_v46, 0.0  ;;  %v5079_v57 = vpack.c.bf16 %v399_v47, %v399_v47  ;;  %v5081_v58 = vpack.c.bf16 %v401_v48, %v401_v48  ;;  %v4306_v34 = vld [vmem:[#allocation10 + $0x3c8] ss:$16 sps:$4 sm:$0xff]   ;;  %v4317_v39 = vld [vmem:[#allocation10 + $0x18c] ss:$16 sps:$4 sm:$0xff]  }
 0x13a   :  { %v4309_v37 = vld [vmem:[#allocation10 + $0x1a8] ss:$16 sps:$4 sm:$0xff]   ;;  %v4320_v40 = vld [vmem:[#allocation10 + $0x38c] ss:$16 sps:$4 sm:$0xff]  }
 0x13b   :  { %v404_v53 = vpack.c.bf16 %v400_v51, %v400_v51  ;;  %v406_v54 = vpack.c.bf16 %v402_v52, %v402_v52  ;;  %v4312_v38 = vld [vmem:[#allocation10 + $0x3a8] ss:$16 sps:$4 sm:$0xff]   ;;  %v4323_v43 = vld [vmem:[#allocation10 + $0x16c] ss:$16 sps:$4 sm:$0xff]  }
 0x13c   :  { %v4315_v41 = vld [vmem:[#allocation10 + $0x188] ss:$16 sps:$4 sm:$0xff]   ;;  %v4326_v44 = vld [vmem:[#allocation10 + $0x36c] ss:$16 sps:$4 sm:$0xff]  }
 0x13d   :  { %1229 = vmatprep.mubr.bf16.mxu0 %v404_v53  ;;  %1270 = vmatprep.mubr.bf16.mxu1 %v406_v54  ;;  %v4318_v42 = vld [vmem:[#allocation10 + $0x388] ss:$16 sps:$4 sm:$0xff]   ;;  %v4329_v47 = vld [vmem:[#allocation10 + $0x14c] ss:$16 sps:$4 sm:$0xff]  }
 0x13e   :  { %1230 = vmatmul.mubr.bf16.vlgmr.msra.gmra.mxu0 %v5079_v57  ;;  %1271 = vmatmul.mubr.bf16.vlgmr.msra.gmra.mxu1 %v5081_v58  ;;  %v4321_v45 = vld [vmem:[#allocation10 + $0x168] ss:$16 sps:$4 sm:$0xff]   ;;  %v4332_v48 = vld [vmem:[#allocation10 + $0x34c] ss:$16 sps:$4 sm:$0xff]  }
 0x13f   :  { %1280 = vmatpush1.bf16.msra.mxu0 %v4249_v55  ;;  %1321 = vmatpush1.bf16.msra.mxu1 %v4252_v56  ;;  %v4324_v46 = vld [vmem:[#allocation10 + $0x368] ss:$16 sps:$4 sm:$0xff]   ;;  %v4335_v51 = vld [vmem:[#allocation10 + $0x12c] ss:$16 sps:$4 sm:$0xff]  }
 0x140   :  { %1311 = vmatprep.mubr.bf16.mxu0 %v404_v53  ;;  %1352 = vmatprep.mubr.bf16.mxu1 %v406_v54  ;;  %v4327_v49 = vld [vmem:[#allocation10 + $0x148] ss:$16 sps:$4 sm:$0xff]   ;;  %v4338_v52 = vld [vmem:[#allocation10 + $0x32c] ss:$16 sps:$4 sm:$0xff]  }
 0x141   :  { %1281 = vmatprep.subr.bf16.mxu0 %v4257_v59  ;;  %1322 = vmatprep.subr.bf16.mxu1 %v4260_v60  ;;  %v4330_v50 = vld [vmem:[#allocation10 + $0x348] ss:$16 sps:$4 sm:$0xff]   ;;  %v4341_v55 = vld [vmem:[#allocation10 + $0x10c] ss:$16 sps:$4 sm:$0xff]  }
 0x142   :  { %v4333_v53 = vld [vmem:[#allocation10 + $0x128] ss:$16 sps:$4 sm:$0xff]   ;;  %v4344_v56 = vld [vmem:[#allocation10 + $0x30c] ss:$16 sps:$4 sm:$0xff]  }
 0x143   :  { %1282 = vmatpush1.bf16.msra.mxu0 %v4255_v61  ;;  %1323 = vmatpush1.bf16.msra.mxu1 %v4258_v62  ;;  %v4336_v54 = vld [vmem:[#allocation10 + $0x328] ss:$16 sps:$4 sm:$0xff]   ;;  %v4347_v61 = vld [vmem:[#allocation11 + $0xe4] ss:$16 sps:$4 sm:$0xff]   ;;  %v4345_v62 = vld [vmem:[#allocation11 + $0xe0] ss:$16 sps:$4 sm:$0xff]  }
 0x144   :  { %1283 = vmatprep.subr.bf16.mxu0 %v4263_v63  ;;  %1324 = vmatprep.subr.bf16.mxu1 %v4266_v0  ;;  %v4339_v59 = vld [vmem:[#allocation10 + $0x108] ss:$16 sps:$4 sm:$0xff]   ;;  %v4350_v63 = vld [vmem:[#allocation11 + $0xc4] ss:$16 sps:$4 sm:$0xff]   ;;  %v4348_v0 = vld [vmem:[#allocation11 + $0xc0] ss:$16 sps:$4 sm:$0xff]  }
 0x145   :  { %v4342_v60 = vld [vmem:[#allocation10 + $0x308] ss:$16 sps:$4 sm:$0xff]  }
 0x147   :  { %1284 = vmatpush1.bf16.msra.mxu0 %v4261_v1  ;;  %1325 = vmatpush1.bf16.msra.mxu1 %v4264_v2  ;;  %v4353_v1 = vld [vmem:[#allocation11 + $0xa4] ss:$16 sps:$4 sm:$0xff]   ;;  %v4351_v2 = vld [vmem:[#allocation11 + $0xa0] ss:$16 sps:$4 sm:$0xff]  }
 0x148   :  { %1285 = vmatprep.subr.bf16.mxu0 %v4269_v3  ;;  %1326 = vmatprep.subr.bf16.mxu1 %v4272_v4  ;;  %v4356_v3 = vld [vmem:[#allocation11 + $0x84] ss:$16 sps:$4 sm:$0xff]   ;;  %v4354_v4 = vld [vmem:[#allocation11 + $0x80] ss:$16 sps:$4 sm:$0xff]  }
 0x14b   :  { %1286 = vmatpush1.bf16.msra.mxu0 %v4267_v5  ;;  %1327 = vmatpush1.bf16.msra.mxu1 %v4270_v6  ;;  %v4393_v5 = vld [vmem:[#allocation11 + $0x2e0] ss:$16 sps:$4 sm:$0xff]   ;;  %v4395_v6 = vld [vmem:[#allocation11 + $0x2e4] ss:$16 sps:$4 sm:$0xff]  }
 0x14c   :  { %1287 = vmatprep.subr.bf16.mxu0 %v4275_v7  ;;  %1328 = vmatprep.subr.bf16.mxu1 %v4278_v8  ;;  %v4359_v7 = vld [vmem:[#allocation11 + $0x64] ss:$16 sps:$4 sm:$0xff]   ;;  %v4399_v8 = vld [vmem:[#allocation11 + $0x2c0] ss:$16 sps:$4 sm:$0xff]  }
 0x14f   :  { %1288 = vmatpush1.bf16.msra.mxu0 %v4273_v9  ;;  %1329 = vmatpush1.bf16.msra.mxu1 %v4276_v10  ;;  %v4362_v9 = vld [vmem:[#allocation11 + $0x44] ss:$16 sps:$4 sm:$0xff]   ;;  %v4360_v10 = vld [vmem:[#allocation11 + $0x40] ss:$16 sps:$4 sm:$0xff]  }
 0x150   :  { %1289 = vmatprep.subr.bf16.mxu0 %v4281_v11  ;;  %1330 = vmatprep.subr.bf16.mxu1 %v4284_v12  ;;  %v4405_v11 = vld [vmem:[#allocation11 + $0x2a0] ss:$16 sps:$4 sm:$0xff]   ;;  %v4407_v12 = vld [vmem:[#allocation11 + $0x2a4] ss:$16 sps:$4 sm:$0xff]  }
 0x153   :  { %1290 = vmatpush1.bf16.msra.mxu0 %v4279_v13  ;;  %1331 = vmatpush1.bf16.msra.mxu1 %v4282_v14  ;;  %v4365_v13 = vld [vmem:[#allocation11 + $0x24] ss:$16 sps:$4 sm:$0xff]   ;;  %v4363_v14 = vld [vmem:[#allocation11 + $0x20] ss:$16 sps:$4 sm:$0xff]  }
 0x154   :  { %1291 = vmatprep.subr.bf16.mxu0 %v4287_v15  ;;  %1332 = vmatprep.subr.bf16.mxu1 %v4290_v16  ;;  %v4411_v15 = vld [vmem:[#allocation11 + $0x280] ss:$16 sps:$4 sm:$0xff]   ;;  %v4413_v16 = vld [vmem:[#allocation11 + $0x284] ss:$16 sps:$4 sm:$0xff]  }
 0x157   :  { %1292 = vmatpush1.bf16.msra.mxu0 %v4285_v17  ;;  %1333 = vmatpush1.bf16.msra.mxu1 %v4288_v20  ;;  %v4368_v17 = vld [vmem:[#allocation11 + $0x4] ss:$16 sps:$4 sm:$0xff]   ;;  %v4366_v20 = vld [vmem:[#allocation11] ss:$16 sps:$4 sm:$0xff]  }
 0x158   :  { %1293 = vmatprep.subr.bf16.mxu0 %v4293_v21  ;;  %1334 = vmatprep.subr.bf16.mxu1 %v4296_v22  ;;  %v4417_v21 = vld [vmem:[#allocation11 + $0x260] ss:$16 sps:$4 sm:$0xff]   ;;  %v4419_v22 = vld [vmem:[#allocation11 + $0x264] ss:$16 sps:$4 sm:$0xff]  }
 0x15b   :  { %1294 = vmatpush1.bf16.msra.mxu0 %v4291_v23  ;;  %1335 = vmatpush1.bf16.msra.mxu1 %v4294_v24  ;;  %v4371_v23 = vld [vmem:[#allocation11 + $0x1e4] ss:$16 sps:$4 sm:$0xff]   ;;  %v4369_v24 = vld [vmem:[#allocation11 + $0x1e0] ss:$16 sps:$4 sm:$0xff]  }
 0x15c   :  { %1295 = vmatprep.subr.bf16.mxu0 %v4299_v27  ;;  %1336 = vmatprep.subr.bf16.mxu1 %v4302_v28  ;;  %v4423_v27 = vld [vmem:[#allocation11 + $0x240] ss:$16 sps:$4 sm:$0xff]   ;;  %v4425_v28 = vld [vmem:[#allocation11 + $0x244] ss:$16 sps:$4 sm:$0xff]  }
 0x15f   :  { %1296 = vmatpush2.bf16.msra.mxu0 %v4297_v29  ;;  %1337 = vmatpush2.bf16.msra.mxu1 %v4300_v30  ;;  %v4374_v29 = vld [vmem:[#allocation11 + $0x1c4] ss:$16 sps:$4 sm:$0xff]   ;;  %v4372_v30 = vld [vmem:[#allocation11 + $0x1c0] ss:$16 sps:$4 sm:$0xff]  }
 0x160   :  { %1297 = vmatprep.subr.bf16.mxu0 %v4305_v31  ;;  %1338 = vmatprep.subr.bf16.mxu1 %v4308_v32  ;;  %v4429_v31 = vld [vmem:[#allocation11 + $0x220] ss:$16 sps:$4 sm:$0xff]   ;;  %v4431_v32 = vld [vmem:[#allocation11 + $0x224] ss:$16 sps:$4 sm:$0xff]  }
 0x163   :  { %1298 = vmatpush2.bf16.msra.mxu0 %v4303_v33  ;;  %1339 = vmatpush2.bf16.msra.mxu1 %v4306_v34  ;;  %v4377_v33 = vld [vmem:[#allocation11 + $0x1a4] ss:$16 sps:$4 sm:$0xff]   ;;  %v4375_v34 = vld [vmem:[#allocation11 + $0x1a0] ss:$16 sps:$4 sm:$0xff]  }
 0x164   :  { %1299 = vmatprep.subr.bf16.mxu0 %v4311_v35  ;;  %1340 = vmatprep.subr.bf16.mxu1 %v4314_v36  ;;  %v4435_v35 = vld [vmem:[#allocation11 + $0x200] ss:$16 sps:$4 sm:$0xff]   ;;  %v4437_v36 = vld [vmem:[#allocation11 + $0x204] ss:$16 sps:$4 sm:$0xff]  }
 0x167   :  { %1300 = vmatpush2.bf16.msra.mxu0 %v4309_v37  ;;  %1341 = vmatpush2.bf16.msra.mxu1 %v4312_v38  ;;  %v4380_v37 = vld [vmem:[#allocation11 + $0x184] ss:$16 sps:$4 sm:$0xff]   ;;  %v4378_v38 = vld [vmem:[#allocation11 + $0x180] ss:$16 sps:$4 sm:$0xff]  }
 0x168   :  { %1301 = vmatprep.subr.bf16.mxu0 %v4317_v39  ;;  %1342 = vmatprep.subr.bf16.mxu1 %v4320_v40  ;;  %v4441_v39 = vld [vmem:[#allocation11 + $0x3e0] ss:$16 sps:$4 sm:$0xff]   ;;  %v4443_v40 = vld [vmem:[#allocation11 + $0x3e4] ss:$16 sps:$4 sm:$0xff]  }
 0x16b   :  { %1302 = vmatpush2.bf16.msra.mxu0 %v4315_v41  ;;  %1343 = vmatpush2.bf16.msra.mxu1 %v4318_v42  ;;  %v4383_v41 = vld [vmem:[#allocation11 + $0x164] ss:$16 sps:$4 sm:$0xff]   ;;  %v4381_v42 = vld [vmem:[#allocation11 + $0x160] ss:$16 sps:$4 sm:$0xff]  }
 0x16c   :  { %1303 = vmatprep.subr.bf16.mxu0 %v4323_v43  ;;  %1344 = vmatprep.subr.bf16.mxu1 %v4326_v44  ;;  %v4447_v43 = vld [vmem:[#allocation11 + $0x3c0] ss:$16 sps:$4 sm:$0xff]   ;;  %v4449_v44 = vld [vmem:[#allocation11 + $0x3c4] ss:$16 sps:$4 sm:$0xff]  }
 0x16f   :  { %1304 = vmatpush2.bf16.msra.mxu0 %v4321_v45  ;;  %1345 = vmatpush2.bf16.msra.mxu1 %v4324_v46  ;;  %v4386_v45 = vld [vmem:[#allocation11 + $0x144] ss:$16 sps:$4 sm:$0xff]   ;;  %v4384_v46 = vld [vmem:[#allocation11 + $0x140] ss:$16 sps:$4 sm:$0xff]  }
 0x170   :  { %1305 = vmatprep.subr.bf16.mxu0 %v4329_v47  ;;  %1346 = vmatprep.subr.bf16.mxu1 %v4332_v48  ;;  %v4453_v47 = vld [vmem:[#allocation11 + $0x3a0] ss:$16 sps:$4 sm:$0xff]   ;;  %v4455_v48 = vld [vmem:[#allocation11 + $0x3a4] ss:$16 sps:$4 sm:$0xff]  }
 0x173   :  { %1306 = vmatpush2.bf16.msra.mxu0 %v4327_v49  ;;  %1347 = vmatpush2.bf16.msra.mxu1 %v4330_v50  ;;  %v4389_v49 = vld [vmem:[#allocation11 + $0x124] ss:$16 sps:$4 sm:$0xff]   ;;  %v4387_v50 = vld [vmem:[#allocation11 + $0x120] ss:$16 sps:$4 sm:$0xff]  }
 0x174   :  { %1307 = vmatprep.subr.bf16.mxu0 %v4335_v51  ;;  %1348 = vmatprep.subr.bf16.mxu1 %v4338_v52  ;;  %v4459_v51 = vld [vmem:[#allocation11 + $0x380] ss:$16 sps:$4 sm:$0xff]   ;;  %v4461_v52 = vld [vmem:[#allocation11 + $0x384] ss:$16 sps:$4 sm:$0xff]  }
 0x177   :  { %1308 = vmatpush2.bf16.msra.mxu0 %v4333_v53  ;;  %1349 = vmatpush2.bf16.msra.mxu1 %v4336_v54  ;;  %v4392_v53 = vld [vmem:[#allocation11 + $0x104] ss:$16 sps:$4 sm:$0xff]   ;;  %v4390_v54 = vld [vmem:[#allocation11 + $0x100] ss:$16 sps:$4 sm:$0xff]  }
 0x178   :  { %1309 = vmatprep.subr.bf16.mxu0 %v4341_v55  ;;  %1350 = vmatprep.subr.bf16.mxu1 %v4344_v56  ;;  %v4465_v55 = vld [vmem:[#allocation11 + $0x360] ss:$16 sps:$4 sm:$0xff]   ;;  %v4467_v56 = vld [vmem:[#allocation11 + $0x364] ss:$16 sps:$4 sm:$0xff]  }
 0x17b   :  { %1310 = vmatpush2.bf16.msra.mxu0 %v4339_v59  ;;  %1351 = vmatpush2.bf16.msra.mxu1 %v4342_v60  ;;  %v4398_v59 = vld [vmem:[#allocation11 + $0xec] ss:$16 sps:$4 sm:$0xff]   ;;  %v4471_v60 = vld [vmem:[#allocation11 + $0x340] ss:$16 sps:$4 sm:$0xff]  }
 0x17c   :  { %2159 = vmatprep.subr.bf16.mxu0 %v4347_v61  ;;  %2200 = vmatprep.subr.bf16.mxu1 %v4395_v6  ;;  %v4473_v61 = vld [vmem:[#allocation11 + $0x344] ss:$16 sps:$4 sm:$0xff]  }
 0x17e   :  { %1312 = vmatmul.mubr.bf16.vlgmr.msra.gmra.mxu0 %v5079_v57  ;;  %1353 = vmatmul.mubr.bf16.vlgmr.msra.gmra.mxu1 %v5081_v58  ;;  %v4357_v57 = vld [vmem:[#allocation11 + $0x60] ss:$16 sps:$4 sm:$0xff]   ;;  %v4401_v58 = vld [vmem:[#allocation11 + $0x2c4] ss:$16 sps:$4 sm:$0xff]  }
 0x17f   :  { %2160 = vmatpush1.bf16.msra.mxu0 %v4345_v62  ;;  %2201 = vmatpush1.bf16.msra.mxu1 %v4393_v5  ;;  %v4479_v62 = vld [vmem:[#allocation11 + $0x324] ss:$16 sps:$4 sm:$0xff]  }
 0x180   :  { %2161 = vmatprep.subr.bf16.mxu0 %v4350_v63  ;;  %2202 = vmatprep.subr.bf16.mxu1 %v4401_v58  ;;  %v4477_v63 = vld [vmem:[#allocation11 + $0x320] ss:$16 sps:$4 sm:$0xff]  }
 0x183   :  { %2162 = vmatpush1.bf16.msra.mxu0 %v4348_v0  ;;  %2203 = vmatpush1.bf16.msra.mxu1 %v4399_v8  ;;  %v4485_v0 = vld [vmem:[#allocation11 + $0x304] ss:$16 sps:$4 sm:$0xff]  }
 0x184   :  { %2163 = vmatprep.subr.bf16.mxu0 %v4353_v1  ;;  %2204 = vmatprep.subr.bf16.mxu1 %v4407_v12  ;;  %v4483_v1 = vld [vmem:[#allocation11 + $0x300] ss:$16 sps:$4 sm:$0xff]  }
 0x187   :  { %2164 = vmatpush1.bf16.msra.mxu0 %v4351_v2  ;;  %2205 = vmatpush1.bf16.msra.mxu1 %v4405_v11  ;;  %v4491_v2 = vld [vmem:[#allocation11 + $0x2ec] ss:$16 sps:$4 sm:$0xff]  }
 0x188   :  { %2165 = vmatprep.subr.bf16.mxu0 %v4356_v3  ;;  %2206 = vmatprep.subr.bf16.mxu1 %v4413_v16  ;;  %v5090_v3 = vld [vmem:[%s5151_s6] sm:$0xf] }
 0x189   :  { %v544_v5 = vrot.slane %v5090_v3, %v5071_v25 }
 0x18b   :  { %2166 = vmatpush1.bf16.msra.mxu0 %v4354_v4  ;;  %2207 = vmatpush1.bf16.msra.mxu1 %v4411_v15  ;;  %v540_v4 = vrot.slane %v5090_v3, %v5064_v18 }
 0x18c   :  { %2167 = vmatprep.subr.bf16.mxu0 %v4359_v7  ;;  %2208 = vmatprep.subr.bf16.mxu1 %v4419_v22 }
 0x18f   :  { %2168 = vmatpush1.bf16.msra.mxu0 %v4357_v57  ;;  %2209 = vmatpush1.bf16.msra.mxu1 %v4417_v21  ;;  %v4396_v21 = vld [vmem:[#allocation11 + $0xe8] ss:$16 sps:$4 sm:$0xff]  }
 0x190   :  { %2169 = vmatprep.subr.bf16.mxu0 %v4362_v9  ;;  %2210 = vmatprep.subr.bf16.mxu1 %v4425_v28  ;;  %v4408_v28 = vld [vmem:[#allocation11 + $0xa8] ss:$16 sps:$4 sm:$0xff]  }
 0x193   :  { %2170 = vmatpush1.bf16.msra.mxu0 %v4360_v10  ;;  %2211 = vmatpush1.bf16.msra.mxu1 %v4423_v27  ;;  %v4410_v27 = vld [vmem:[#allocation11 + $0xac] ss:$16 sps:$4 sm:$0xff]  }
 0x194   :  { %2171 = vmatprep.subr.bf16.mxu0 %v4365_v13  ;;  %2212 = vmatprep.subr.bf16.mxu1 %v4431_v32  ;;  %v4420_v32 = vld [vmem:[#allocation11 + $0x68] ss:$16 sps:$4 sm:$0xff]  }
 0x197   :  { %2172 = vmatpush1.bf16.msra.mxu0 %v4363_v14  ;;  %2213 = vmatpush1.bf16.msra.mxu1 %v4429_v31  ;;  %v4422_v31 = vld [vmem:[#allocation11 + $0x6c] ss:$16 sps:$4 sm:$0xff]  }
 0x198   :  { %2173 = vmatprep.subr.bf16.mxu0 %v4368_v17  ;;  %2214 = vmatprep.subr.bf16.mxu1 %v4437_v36  ;;  %v4432_v36 = vld [vmem:[#allocation11 + $0x28] ss:$16 sps:$4 sm:$0xff]  }
 0x19b   :  { %2174 = vmatpush1.bf16.msra.mxu0 %v4366_v20  ;;  %2215 = vmatpush1.bf16.msra.mxu1 %v4435_v35  ;;  %v4434_v35 = vld [vmem:[#allocation11 + $0x2c] ss:$16 sps:$4 sm:$0xff]  }
 0x19c   :  { %2175 = vmatprep.subr.bf16.mxu0 %v4371_v23  ;;  %2216 = vmatprep.subr.bf16.mxu1 %v4443_v40  ;;  %v4404_v23 = vld [vmem:[#allocation11 + $0xcc] ss:$16 sps:$4 sm:$0xff]   ;;  %v4444_v40 = vld [vmem:[#allocation11 + $0x1e8] ss:$16 sps:$4 sm:$0xff]  }
 0x19f   :  { %2176 = vmatpush2.bf16.msra.mxu0 %v4369_v24  ;;  %2217 = vmatpush2.bf16.msra.mxu1 %v4441_v39  ;;  %v4402_v24 = vld [vmem:[#allocation11 + $0xc8] ss:$16 sps:$4 sm:$0xff]   ;;  %v4446_v39 = vld [vmem:[#allocation11 + $0x1ec] ss:$16 sps:$4 sm:$0xff]  }
 0x1a0   :  { %2177 = vmatprep.subr.bf16.mxu0 %v4374_v29  ;;  %2218 = vmatprep.subr.bf16.mxu1 %v4449_v44  ;;  %v4416_v29 = vld [vmem:[#allocation11 + $0x8c] ss:$16 sps:$4 sm:$0xff]   ;;  %v4456_v44 = vld [vmem:[#allocation11 + $0x1a8] ss:$16 sps:$4 sm:$0xff]  }
 0x1a3   :  { %2178 = vmatpush2.bf16.msra.mxu0 %v4372_v30  ;;  %2219 = vmatpush2.bf16.msra.mxu1 %v4447_v43  ;;  %v4414_v30 = vld [vmem:[#allocation11 + $0x88] ss:$16 sps:$4 sm:$0xff]   ;;  %v4458_v43 = vld [vmem:[#allocation11 + $0x1ac] ss:$16 sps:$4 sm:$0xff]  }
 0x1a4   :  { %2179 = vmatprep.subr.bf16.mxu0 %v4377_v33  ;;  %2220 = vmatprep.subr.bf16.mxu1 %v4455_v48  ;;  %v4428_v33 = vld [vmem:[#allocation11 + $0x4c] ss:$16 sps:$4 sm:$0xff]   ;;  %v4468_v48 = vld [vmem:[#allocation11 + $0x168] ss:$16 sps:$4 sm:$0xff]  }
 0x1a7   :  { %2180 = vmatpush2.bf16.msra.mxu0 %v4375_v34  ;;  %2221 = vmatpush2.bf16.msra.mxu1 %v4453_v47  ;;  %v4426_v34 = vld [vmem:[#allocation11 + $0x48] ss:$16 sps:$4 sm:$0xff]   ;;  %v4470_v47 = vld [vmem:[#allocation11 + $0x16c] ss:$16 sps:$4 sm:$0xff]  }
 0x1a8   :  { %2181 = vmatprep.subr.bf16.mxu0 %v4380_v37  ;;  %2222 = vmatprep.subr.bf16.mxu1 %v4461_v52  ;;  %v4440_v37 = vld [vmem:[#allocation11 + $0xc] ss:$16 sps:$4 sm:$0xff]  }
 0x1a9   :  { %v4482_v52 = vld [vmem:[#allocation11 + $0x12c] ss:$16 sps:$4 sm:$0xff]  }
 0x1ab   :  { %2182 = vmatpush2.bf16.msra.mxu0 %v4378_v38  ;;  %2223 = vmatpush2.bf16.msra.mxu1 %v4459_v51  ;;  %v4438_v38 = vld [vmem:[#allocation11 + $0x8] ss:$16 sps:$4 sm:$0xff]  }
 0x1ac   :  { %2183 = vmatprep.subr.bf16.mxu0 %v4383_v41  ;;  %2224 = vmatprep.subr.bf16.mxu1 %v4467_v56  ;;  %v4452_v41 = vld [vmem:[#allocation11 + $0x1cc] ss:$16 sps:$4 sm:$0xff]   ;;  %v4474_v51 = vld [vmem:[#allocation11 + $0x148] ss:$16 sps:$4 sm:$0xff]  }
 0x1af   :  { %2184 = vmatpush2.bf16.msra.mxu0 %v4381_v42  ;;  %2225 = vmatpush2.bf16.msra.mxu1 %v4465_v55  ;;  %v4450_v42 = vld [vmem:[#allocation11 + $0x1c8] ss:$16 sps:$4 sm:$0xff]  }
 0x1b0   :  { %2185 = vmatprep.subr.bf16.mxu0 %v4386_v45  ;;  %2226 = vmatprep.subr.bf16.mxu1 %v4473_v61  ;;  %v4464_v45 = vld [vmem:[#allocation11 + $0x18c] ss:$16 sps:$4 sm:$0xff]  }
 0x1b3   :  { %2186 = vmatpush2.bf16.msra.mxu0 %v4384_v46  ;;  %2227 = vmatpush2.bf16.msra.mxu1 %v4471_v60  ;;  %v4462_v46 = vld [vmem:[#allocation11 + $0x188] ss:$16 sps:$4 sm:$0xff]  }
 0x1b4   :  { %2187 = vmatprep.subr.bf16.mxu0 %v4389_v49  ;;  %2228 = vmatprep.subr.bf16.mxu1 %v4479_v62  ;;  %v4476_v49 = vld [vmem:[#allocation11 + $0x14c] ss:$16 sps:$4 sm:$0xff]  }
 0x1b5   :  { %v4488_v62 = vld [vmem:[#allocation11 + $0x10c] ss:$16 sps:$4 sm:$0xff]  }
 0x1b7   :  { %2188 = vmatpush2.bf16.msra.mxu0 %v4387_v50  ;;  %2229 = vmatpush2.bf16.msra.mxu1 %v4477_v63  ;;  %v548_v50 = vrot.slane %v5090_v3, %v5066_v19 }
 0x1b8   :  { %2189 = vmatprep.subr.bf16.mxu0 %v4392_v53  ;;  %2230 = vmatprep.subr.bf16.mxu1 %v4485_v0  ;;  %v552_v53 = vrot.slane %v5090_v3, %v5073_v26 }
 0x1bb   :  { %2190 = vmatpush2.bf16.msra.mxu0 %v4390_v54  ;;  %2231 = vmatpush2.bf16.msra.mxu1 %v4483_v1 }
 0x1bc   :  { %2241 = vmatprep.subr.bf16.mxu0 %v4398_v59  ;;  %2282 = vmatprep.subr.bf16.mxu1 %v4491_v2  ;;  %v4480_v59 = vld [vmem:[#allocation11 + $0x128] ss:$16 sps:$4 sm:$0xff]  }
 0x1fe   :  { %v1231_v6 = vpop.f32.mrf.mxu0  ;;  %v1272_v7 = vpop.f32.mrf.mxu1 }
 0x1ff   :  { %v1232_v57 = vadd.f32 %v1231_v6, %v540_v4 }
 0x200   :  { %v1233_v8 = vpop.f32.mrf.mxu0  ;;  %v1274_v58 = vpop.f32.mrf.mxu1 }
 0x201   :  { %v1273_v9 = vadd.f32 %v1272_v7, %v1232_v57  ;;  %v1234_v10 = vadd.f32 %v1233_v8, %v544_v5  ;;  %v4486_v5 = vld [vmem:[#allocation11 + $0x108] ss:$16 sps:$4 sm:$0xff]  }
 0x202   :  { %v1235_v11 = vpop.f32.mrf.mxu0  ;;  %v1276_v12 = vpop.f32.mrf.mxu1 }
 0x203   :  { %v1275_v13 = vadd.f32 %v1274_v58, %v1234_v10  ;;  %v1361_v14 = vmax.f32 %v1273_v9, 0.0  ;;  %v4489_v58 = vld [vmem:[#allocation11 + $0x2e8] ss:$16 sps:$4 sm:$0xff]   ;;  %v4494_v10 = vld [vmem:[#allocation11 + $0x2cc] ss:$16 sps:$4 sm:$0xff]  }
 0x204   :  { %v1236_v15 = vpop.f32.mrf.mxu0  ;;  %v1277_v16 = vpop.f32.mrf.mxu1  ;;  %v4492_v11 = vld [vmem:[#allocation11 + $0x2c8] ss:$16 sps:$4 sm:$0xff]   ;;  %v4497_v12 = vld [vmem:[#allocation11 + $0x2ac] ss:$16 sps:$4 sm:$0xff]  }
 0x205   :  { %v1362_v17 = vmax.f32 %v1275_v13, 0.0  ;;  %v5096_v22 = vpack.c.bf16 %v1361_v14, %v1361_v14  ;;  %v4495_v13 = vld [vmem:[#allocation11 + $0x2a8] ss:$16 sps:$4 sm:$0xff]   ;;  %v4500_v14 = vld [vmem:[#allocation11 + $0x28c] ss:$16 sps:$4 sm:$0xff]  }
 0x206   :  { %v4537_v15 = vld [vmem:[#allocation13 + $0xe0] ss:$16 sps:$4 sm:$0xff]   ;;  %v4539_v16 = vld [vmem:[#allocation13 + $0xe4] ss:$16 sps:$4 sm:$0xff]  }
 0x207   :  { %v1366_v20 = vpack.c.bf16 %v1362_v17, %v1362_v17  ;;  %v4542_v17 = vld [vmem:[#allocation13 + $0xc4] ss:$16 sps:$4 sm:$0xff]  }
 0x209   :  { %2191 = vmatprep.mubr.bf16.mxu0 %v1366_v20 }
 0x20a   :  { %2192 = vmatmul.mubr.bf16.vlgmr.msra.gmra.mxu0 %v5096_v22 }
 0x20b   :  { %2242 = vmatpush1.bf16.msra.mxu0 %v4396_v21  ;;  %2273 = vmatprep.mubr.bf16.mxu0 %v1366_v20  ;;  %v4498_v20 = vld [vmem:[#allocation11 + $0x288] ss:$16 sps:$4 sm:$0xff]   ;;  %v4540_v21 = vld [vmem:[#allocation13 + $0xc0] ss:$16 sps:$4 sm:$0xff]  }
 0x20c   :  { %2243 = vmatprep.subr.bf16.mxu0 %v4404_v23  ;;  %v4503_v23 = vld [vmem:[#allocation11 + $0x26c] ss:$16 sps:$4 sm:$0xff]  }
 0x20f   :  { %2244 = vmatpush1.bf16.msra.mxu0 %v4402_v24  ;;  %v4501_v24 = vld [vmem:[#allocation11 + $0x268] ss:$16 sps:$4 sm:$0xff]  }
 0x210   :  { %2245 = vmatprep.subr.bf16.mxu0 %v4410_v27  ;;  %v4543_v27 = vld [vmem:[#allocation13 + $0xa0] ss:$16 sps:$4 sm:$0xff]  }
 0x213   :  { %2246 = vmatpush1.bf16.msra.mxu0 %v4408_v28  ;;  %v4506_v28 = vld [vmem:[#allocation11 + $0x24c] ss:$16 sps:$4 sm:$0xff]  }
 0x214   :  { %2247 = vmatprep.subr.bf16.mxu0 %v4416_v29  ;;  %v4548_v29 = vld [vmem:[#allocation13 + $0x84] ss:$16 sps:$4 sm:$0xff]  }
 0x217   :  { %2248 = vmatpush1.bf16.msra.mxu0 %v4414_v30  ;;  %v4504_v30 = vld [vmem:[#allocation11 + $0x248] ss:$16 sps:$4 sm:$0xff]  }
 0x218   :  { %2249 = vmatprep.subr.bf16.mxu0 %v4422_v31  ;;  %v4546_v31 = vld [vmem:[#allocation13 + $0x80] ss:$16 sps:$4 sm:$0xff]  }
 0x21b   :  { %2250 = vmatpush1.bf16.msra.mxu0 %v4420_v32  ;;  %v4509_v32 = vld [vmem:[#allocation11 + $0x22c] ss:$16 sps:$4 sm:$0xff]  }
 0x21c   :  { %2251 = vmatprep.subr.bf16.mxu0 %v4428_v33  ;;  %v4551_v33 = vld [vmem:[#allocation13 + $0x64] ss:$16 sps:$4 sm:$0xff]  }
 0x21f   :  { %2252 = vmatpush1.bf16.msra.mxu0 %v4426_v34  ;;  %v4507_v34 = vld [vmem:[#allocation11 + $0x228] ss:$16 sps:$4 sm:$0xff]  }
 0x220   :  { %2253 = vmatprep.subr.bf16.mxu0 %v4434_v35  ;;  %v4549_v35 = vld [vmem:[#allocation13 + $0x60] ss:$16 sps:$4 sm:$0xff]  }
 0x223   :  { %2254 = vmatpush1.bf16.msra.mxu0 %v4432_v36  ;;  %v4512_v36 = vld [vmem:[#allocation11 + $0x20c] ss:$16 sps:$4 sm:$0xff]  }
 0x224   :  { %2255 = vmatprep.subr.bf16.mxu0 %v4440_v37  ;;  %v4554_v37 = vld [vmem:[#allocation13 + $0x44] ss:$16 sps:$4 sm:$0xff]  }
 0x227   :  { %2256 = vmatpush1.bf16.msra.mxu0 %v4438_v38  ;;  %v4510_v38 = vld [vmem:[#allocation11 + $0x208] ss:$16 sps:$4 sm:$0xff]  }
 0x228   :  { %2257 = vmatprep.subr.bf16.mxu0 %v4446_v39  ;;  %v4552_v39 = vld [vmem:[#allocation13 + $0x40] ss:$16 sps:$4 sm:$0xff]  }
 0x22b   :  { %2258 = vmatpush2.bf16.msra.mxu0 %v4444_v40  ;;  %v4515_v40 = vld [vmem:[#allocation11 + $0x3ec] ss:$16 sps:$4 sm:$0xff]  }
 0x22c   :  { %2259 = vmatprep.subr.bf16.mxu0 %v4452_v41  ;;  %v4557_v41 = vld [vmem:[#allocation13 + $0x24] ss:$16 sps:$4 sm:$0xff]  }
 0x22f   :  { %2260 = vmatpush2.bf16.msra.mxu0 %v4450_v42  ;;  %v4513_v42 = vld [vmem:[#allocation11 + $0x3e8] ss:$16 sps:$4 sm:$0xff]  }
 0x230   :  { %2261 = vmatprep.subr.bf16.mxu0 %v4458_v43  ;;  %v4555_v43 = vld [vmem:[#allocation13 + $0x20] ss:$16 sps:$4 sm:$0xff]  }
 0x233   :  { %2262 = vmatpush2.bf16.msra.mxu0 %v4456_v44  ;;  %v4518_v44 = vld [vmem:[#allocation11 + $0x3cc] ss:$16 sps:$4 sm:$0xff]  }
 0x234   :  { %2263 = vmatprep.subr.bf16.mxu0 %v4464_v45  ;;  %v4560_v45 = vld [vmem:[#allocation13 + $0x4] ss:$16 sps:$4 sm:$0xff]  }
 0x237   :  { %2264 = vmatpush2.bf16.msra.mxu0 %v4462_v46  ;;  %v4516_v46 = vld [vmem:[#allocation11 + $0x3c8] ss:$16 sps:$4 sm:$0xff]  }
 0x238   :  { %2265 = vmatprep.subr.bf16.mxu0 %v4470_v47  ;;  %v4558_v47 = vld [vmem:[#allocation13] ss:$16 sps:$4 sm:$0xff]  }
 0x23b   :  { %2266 = vmatpush2.bf16.msra.mxu0 %v4468_v48  ;;  %v4521_v48 = vld [vmem:[#allocation11 + $0x3ac] ss:$16 sps:$4 sm:$0xff]  }
 0x23c   :  { %2267 = vmatprep.subr.bf16.mxu0 %v4476_v49  ;;  %v4563_v49 = vld [vmem:[#allocation13 + $0x1e4] ss:$16 sps:$4 sm:$0xff]  }
 0x23e   :  { %v1313_v54 = vpop.f32.mrf.mxu0  ;;  %v1354_v55 = vpop.f32.mrf.mxu1 }
 0x23f   :  { %v1314_v56 = vadd.f32 %v1313_v54, %v548_v50  ;;  %2268 = vmatpush2.bf16.msra.mxu0 %v4474_v51  ;;  %v4519_v50 = vld [vmem:[#allocation11 + $0x3a8] ss:$16 sps:$4 sm:$0xff]   ;;  %v4561_v51 = vld [vmem:[#allocation13 + $0x1e0] ss:$16 sps:$4 sm:$0xff]  }
 0x240   :  { %v1315_v60 = vpop.f32.mrf.mxu0  ;;  %v1356_v61 = vpop.f32.mrf.mxu1  ;;  %2269 = vmatprep.subr.bf16.mxu0 %v4482_v52  ;;  %v4524_v52 = vld [vmem:[#allocation11 + $0x38c] ss:$16 sps:$4 sm:$0xff]   ;;  %v4522_v54 = vld [vmem:[#allocation11 + $0x388] ss:$16 sps:$4 sm:$0xff]  }
 0x241   :  { %v1355_v63 = vadd.f32 %v1354_v55, %v1314_v56  ;;  %v1316_v0 = vadd.f32 %v1315_v60, %v552_v53  ;;  %v4566_v53 = vld [vmem:[#allocation13 + $0x1c4] ss:$16 sps:$4 sm:$0xff]   ;;  %v4564_v55 = vld [vmem:[#allocation13 + $0x1c0] ss:$16 sps:$4 sm:$0xff]   ;;  %v4527_v56 = vld [vmem:[#allocation11 + $0x36c] ss:$16 sps:$4 sm:$0xff]  }
 0x242   :  { %v1317_v1 = vpop.f32.mrf.mxu0  ;;  %v1358_v2 = vpop.f32.mrf.mxu1  ;;  %v4525_v60 = vld [vmem:[#allocation11 + $0x368] ss:$16 sps:$4 sm:$0xff]  }
 0x243   :  { %v1357_v4 = vadd.f32 %v1356_v61, %v1316_v0  ;;  %2270 = vmatpush2.bf16.msra.mxu0 %v4480_v59  ;;  %v1363_v6 = vmax.f32 %v1355_v63, 0.0  ;;  %v4569_v59 = vld [vmem:[#allocation13 + $0x1a4] ss:$16 sps:$4 sm:$0xff]   ;;  %v4567_v61 = vld [vmem:[#allocation13 + $0x1a0] ss:$16 sps:$4 sm:$0xff]  }
 0x244   :  { %v1318_v7 = vpop.f32.mrf.mxu0  ;;  %v1359_v57 = vpop.f32.mrf.mxu1  ;;  %2271 = vmatprep.subr.bf16.mxu0 %v4488_v62  ;;  %v4530_v62 = vld [vmem:[#allocation11 + $0x34c] ss:$16 sps:$4 sm:$0xff]   ;;  %v4572_v63 = vld [vmem:[#allocation13 + $0x184] ss:$16 sps:$4 sm:$0xff]   ;;  %v4528_v0 = vld [vmem:[#allocation11 + $0x348] ss:$16 sps:$4 sm:$0xff]  }
 0x245   :  { %v1364_v3 = vmax.f32 %v1357_v4, 0.0  ;;  %v5103_v9 = vpack.c.bf16 %v1363_v6, %v1363_v6  ;;  %v4570_v1 = vld [vmem:[#allocation13 + $0x180] ss:$16 sps:$4 sm:$0xff]   ;;  %v4533_v2 = vld [vmem:[#allocation11 + $0x32c] ss:$16 sps:$4 sm:$0xff]  }
 0x246   :  { %v4575_v4 = vld [vmem:[#allocation13 + $0x164] ss:$16 sps:$4 sm:$0xff]   ;;  %v4573_v6 = vld [vmem:[#allocation13 + $0x160] ss:$16 sps:$4 sm:$0xff]   ;;  %v4536_v7 = vld [vmem:[#allocation11 + $0x30c] ss:$16 sps:$4 sm:$0xff]  }
 0x247   :  { %v1368_v8 = vpack.c.bf16 %v1364_v3, %v1364_v3  ;;  %2272 = vmatpush2.bf16.msra.mxu0 %v4486_v5  ;;  %v4531_v5 = vld [vmem:[#allocation11 + $0x328] ss:$16 sps:$4 sm:$0xff]   ;;  %v4578_v57 = vld [vmem:[#allocation13 + $0x144] ss:$16 sps:$4 sm:$0xff]  }
 0x248   :  { %3121 = vmatprep.subr.bf16.mxu0 %v4539_v16  ;;  %v4534_v3 = vld [vmem:[#allocation11 + $0x308] ss:$16 sps:$4 sm:$0xff]   ;;  %v4591_v16 = vld [vmem:[#allocation13 + $0x2c0] ss:$16 sps:$4 sm:$0xff]  }
 0x249   :  { %2232 = vmatprep.mubr.bf16.mxu1 %v1368_v8 }
 0x24a   :  { %2233 = vmatmul.mubr.bf16.vlgmr.msra.gmra.mxu1 %v5103_v9  ;;  %2274 = vmatmul.mubr.bf16.vlgmr.msra.gmra.mxu0 %v5096_v22  ;;  %v4545_v22 = vld [vmem:[#allocation13 + $0xa4] ss:$16 sps:$4 sm:$0xff]  }
 0x24b   :  { %2283 = vmatpush1.bf16.msra.mxu1 %v4489_v58  ;;  %2314 = vmatprep.mubr.bf16.mxu1 %v1368_v8  ;;  %v4576_v8 = vld [vmem:[#allocation13 + $0x140] ss:$16 sps:$4 sm:$0xff]   ;;  %v4581_v58 = vld [vmem:[#allocation13 + $0x124] ss:$16 sps:$4 sm:$0xff]  }
 0x24c   :  { %2284 = vmatprep.subr.bf16.mxu1 %v4494_v10  ;;  %3122 = vmatpush1.bf16.msra.mxu0 %v4537_v15  ;;  %v4579_v10 = vld [vmem:[#allocation13 + $0x120] ss:$16 sps:$4 sm:$0xff]   ;;  %v4590_v15 = vld [vmem:[#allocation13 + $0xec] ss:$16 sps:$4 sm:$0xff]  }
 0x24d   :  { %3123 = vmatprep.subr.bf16.mxu0 %v4542_v17  ;;  %v4593_v17 = vld [vmem:[#allocation13 + $0x2c4] ss:$16 sps:$4 sm:$0xff]  }
 0x24f   :  { %2285 = vmatpush1.bf16.msra.mxu1 %v4492_v11  ;;  %v4584_v11 = vld [vmem:[#allocation13 + $0x104] ss:$16 sps:$4 sm:$0xff]  }
 0x250   :  { %2286 = vmatprep.subr.bf16.mxu1 %v4497_v12  ;;  %3124 = vmatpush1.bf16.msra.mxu0 %v4540_v21  ;;  %v4582_v12 = vld [vmem:[#allocation13 + $0x100] ss:$16 sps:$4 sm:$0xff]  }
 0x251   :  { %3125 = vmatprep.subr.bf16.mxu0 %v4545_v22  ;;  %v4603_v21 = vld [vmem:[#allocation13 + $0x280] ss:$16 sps:$4 sm:$0xff]  }
 0x252   :  { %v4609_v22 = vld [vmem:[#allocation13 + $0x260] ss:$16 sps:$4 sm:$0xff]  }
 0x253   :  { %2287 = vmatpush1.bf16.msra.mxu1 %v4495_v13  ;;  %v4585_v13 = vld [vmem:[#allocation13 + $0x2e0] ss:$16 sps:$4 sm:$0xff]  }
 0x254   :  { %2288 = vmatprep.subr.bf16.mxu1 %v4500_v14  ;;  %3126 = vmatpush1.bf16.msra.mxu0 %v4543_v27  ;;  %v4587_v14 = vld [vmem:[#allocation13 + $0x2e4] ss:$16 sps:$4 sm:$0xff]   ;;  %v4615_v27 = vld [vmem:[#allocation13 + $0x240] ss:$16 sps:$4 sm:$0xff]  }
 0x255   :  { %3127 = vmatprep.subr.bf16.mxu0 %v4548_v29  ;;  %v4621_v29 = vld [vmem:[#allocation13 + $0x220] ss:$16 sps:$4 sm:$0xff]  }
 0x257   :  { %2289 = vmatpush1.bf16.msra.mxu1 %v4498_v20  ;;  %v4597_v20 = vld [vmem:[#allocation13 + $0x2a0] ss:$16 sps:$4 sm:$0xff]  }
 0x258   :  { %2290 = vmatprep.subr.bf16.mxu1 %v4503_v23  ;;  %3128 = vmatpush1.bf16.msra.mxu0 %v4546_v31  ;;  %v4605_v23 = vld [vmem:[#allocation13 + $0x284] ss:$16 sps:$4 sm:$0xff]   ;;  %v4627_v31 = vld [vmem:[#allocation13 + $0x200] ss:$16 sps:$4 sm:$0xff]  }
 0x259   :  { %3129 = vmatprep.subr.bf16.mxu0 %v4551_v33  ;;  %v4633_v33 = vld [vmem:[#allocation13 + $0x3e0] ss:$16 sps:$4 sm:$0xff]  }
 0x25b   :  { %2291 = vmatpush1.bf16.msra.mxu1 %v4501_v24  ;;  %v4611_v24 = vld [vmem:[#allocation13 + $0x264] ss:$16 sps:$4 sm:$0xff]  }
 0x25c   :  { %2292 = vmatprep.subr.bf16.mxu1 %v4506_v28  ;;  %3130 = vmatpush1.bf16.msra.mxu0 %v4549_v35  ;;  %v4617_v28 = vld [vmem:[#allocation13 + $0x244] ss:$16 sps:$4 sm:$0xff]   ;;  %v4639_v35 = vld [vmem:[#allocation13 + $0x3c0] ss:$16 sps:$4 sm:$0xff]  }
 0x25d   :  { %3131 = vmatprep.subr.bf16.mxu0 %v4554_v37  ;;  %v4645_v37 = vld [vmem:[#allocation13 + $0x3a0] ss:$16 sps:$4 sm:$0xff]  }
 0x25f   :  { %2293 = vmatpush1.bf16.msra.mxu1 %v4504_v30  ;;  %v4623_v30 = vld [vmem:[#allocation13 + $0x224] ss:$16 sps:$4 sm:$0xff]  }
 0x260   :  { %2294 = vmatprep.subr.bf16.mxu1 %v4509_v32  ;;  %3132 = vmatpush1.bf16.msra.mxu0 %v4552_v39  ;;  %v4629_v32 = vld [vmem:[#allocation13 + $0x204] ss:$16 sps:$4 sm:$0xff]   ;;  %v4651_v39 = vld [vmem:[#allocation13 + $0x380] ss:$16 sps:$4 sm:$0xff]  }
 0x261   :  { %3133 = vmatprep.subr.bf16.mxu0 %v4557_v41  ;;  %v4657_v41 = vld [vmem:[#allocation13 + $0x360] ss:$16 sps:$4 sm:$0xff]  }
 0x263   :  { %2295 = vmatpush1.bf16.msra.mxu1 %v4507_v34  ;;  %v4635_v34 = vld [vmem:[#allocation13 + $0x3e4] ss:$16 sps:$4 sm:$0xff]  }
 0x264   :  { %2296 = vmatprep.subr.bf16.mxu1 %v4512_v36  ;;  %3134 = vmatpush1.bf16.msra.mxu0 %v4555_v43  ;;  %v4641_v36 = vld [vmem:[#allocation13 + $0x3c4] ss:$16 sps:$4 sm:$0xff]   ;;  %v4663_v43 = vld [vmem:[#allocation13 + $0x340] ss:$16 sps:$4 sm:$0xff]  }
 0x265   :  { %3135 = vmatprep.subr.bf16.mxu0 %v4560_v45  ;;  %v4671_v45 = vld [vmem:[#allocation13 + $0x324] ss:$16 sps:$4 sm:$0xff]  }
 0x267   :  { %2297 = vmatpush1.bf16.msra.mxu1 %v4510_v38  ;;  %v4647_v38 = vld [vmem:[#allocation13 + $0x3a4] ss:$16 sps:$4 sm:$0xff]  }
 0x268   :  { %2298 = vmatprep.subr.bf16.mxu1 %v4515_v40  ;;  %3136 = vmatpush1.bf16.msra.mxu0 %v4558_v47  ;;  %v4653_v40 = vld [vmem:[#allocation13 + $0x384] ss:$16 sps:$4 sm:$0xff]   ;;  %v4669_v47 = vld [vmem:[#allocation13 + $0x320] ss:$16 sps:$4 sm:$0xff]  }
 0x269   :  { %3137 = vmatprep.subr.bf16.mxu0 %v4563_v49  ;;  %v4677_v49 = vld [vmem:[#allocation13 + $0x304] ss:$16 sps:$4 sm:$0xff]  }
 0x26b   :  { %2299 = vmatpush2.bf16.msra.mxu1 %v4513_v42  ;;  %v4659_v42 = vld [vmem:[#allocation13 + $0x364] ss:$16 sps:$4 sm:$0xff]  }
 0x26c   :  { %2300 = vmatprep.subr.bf16.mxu1 %v4518_v44  ;;  %3138 = vmatpush2.bf16.msra.mxu0 %v4561_v51  ;;  %v4665_v44 = vld [vmem:[#allocation13 + $0x344] ss:$16 sps:$4 sm:$0xff]   ;;  %v4675_v51 = vld [vmem:[#allocation13 + $0x300] ss:$16 sps:$4 sm:$0xff]  }
 0x26d   :  { %3139 = vmatprep.subr.bf16.mxu0 %v4566_v53  ;;  %v4683_v53 = vld [vmem:[#allocation13 + $0x2ec] ss:$16 sps:$4 sm:$0xff]  }
 0x26f   :  { %2301 = vmatpush2.bf16.msra.mxu1 %v4516_v46 }
 0x270   :  { %2302 = vmatprep.subr.bf16.mxu1 %v4521_v48  ;;  %3140 = vmatpush2.bf16.msra.mxu0 %v4564_v55 }
 0x271   :  { %3141 = vmatprep.subr.bf16.mxu0 %v4569_v59 }
 0x273   :  { %2303 = vmatpush2.bf16.msra.mxu1 %v4519_v50 }
 0x274   :  { %2304 = vmatprep.subr.bf16.mxu1 %v4524_v52  ;;  %3142 = vmatpush2.bf16.msra.mxu0 %v4567_v61 }
 0x275   :  { %3143 = vmatprep.subr.bf16.mxu0 %v4572_v63 }
 0x277   :  { %2305 = vmatpush2.bf16.msra.mxu1 %v4522_v54  ;;  %v5111_v54 = vld [vmem:[%s5153_s8] sm:$0xf] }
 0x278   :  { %2306 = vmatprep.subr.bf16.mxu1 %v4527_v56  ;;  %3144 = vmatpush2.bf16.msra.mxu0 %v4570_v1  ;;  %v1502_v55 = vrot.slane %v5111_v54, %v5064_v18  ;;  %v1506_v56 = vrot.slane %v5111_v54, %v5071_v25 }
 0x279   :  { %3145 = vmatprep.subr.bf16.mxu0 %v4575_v4 }
 0x27b   :  { %2307 = vmatpush2.bf16.msra.mxu1 %v4525_v60 }
 0x27c   :  { %2308 = vmatprep.subr.bf16.mxu1 %v4530_v62  ;;  %3146 = vmatpush2.bf16.msra.mxu0 %v4573_v6 }
 0x27d   :  { %3147 = vmatprep.subr.bf16.mxu0 %v4578_v57 }
 0x27f   :  { %2309 = vmatpush2.bf16.msra.mxu1 %v4528_v0 }
 0x280   :  { %2310 = vmatprep.subr.bf16.mxu1 %v4533_v2  ;;  %3148 = vmatpush2.bf16.msra.mxu0 %v4576_v8 }
 0x281   :  { %3149 = vmatprep.subr.bf16.mxu0 %v4581_v58  ;;  %v4588_v58 = vld [vmem:[#allocation13 + $0xe8] ss:$16 sps:$4 sm:$0xff]  }
 0x283   :  { %2311 = vmatpush2.bf16.msra.mxu1 %v4531_v5 }
 0x284   :  { %2312 = vmatprep.subr.bf16.mxu1 %v4536_v7  ;;  %3150 = vmatpush2.bf16.msra.mxu0 %v4579_v10 }
 0x285   :  { %3151 = vmatprep.subr.bf16.mxu0 %v4584_v11  ;;  %v4596_v11 = vld [vmem:[#allocation13 + $0xcc] ss:$16 sps:$4 sm:$0xff]  }
 0x287   :  { %2313 = vmatpush2.bf16.msra.mxu1 %v4534_v3 }
 0x288   :  { %3152 = vmatpush2.bf16.msra.mxu0 %v4582_v12  ;;  %3162 = vmatprep.subr.bf16.mxu1 %v4587_v14  ;;  %v4594_v12 = vld [vmem:[#allocation13 + $0xc8] ss:$16 sps:$4 sm:$0xff]  }
 0x289   :  { %3203 = vmatprep.subr.bf16.mxu0 %v4590_v15  ;;  %v4600_v14 = vld [vmem:[#allocation13 + $0xa8] ss:$16 sps:$4 sm:$0xff]   ;;  %v4608_v15 = vld [vmem:[#allocation13 + $0x8c] ss:$16 sps:$4 sm:$0xff]  }
 0x28a   :  { %2315 = vmatmul.mubr.bf16.vlgmr.msra.gmra.mxu1 %v5103_v9  ;;  %v4599_v9 = vld [vmem:[#allocation13 + $0x2a4] ss:$16 sps:$4 sm:$0xff]  }
 0x28b   :  { %3163 = vmatpush1.bf16.msra.mxu1 %v4585_v13  ;;  %v4602_v13 = vld [vmem:[#allocation13 + $0xac] ss:$16 sps:$4 sm:$0xff]  }
 0x28c   :  { %3164 = vmatprep.subr.bf16.mxu1 %v4593_v17  ;;  %v4614_v17 = vld [vmem:[#allocation13 + $0x6c] ss:$16 sps:$4 sm:$0xff]  }
 0x28f   :  { %3165 = vmatpush1.bf16.msra.mxu1 %v4591_v16  ;;  %v4606_v16 = vld [vmem:[#allocation13 + $0x88] ss:$16 sps:$4 sm:$0xff]  }
 0x290   :  { %3166 = vmatprep.subr.bf16.mxu1 %v4599_v9  ;;  %v4620_v9 = vld [vmem:[#allocation13 + $0x4c] ss:$16 sps:$4 sm:$0xff]  }
 0x293   :  { %3167 = vmatpush1.bf16.msra.mxu1 %v4597_v20  ;;  %v4612_v20 = vld [vmem:[#allocation13 + $0x68] ss:$16 sps:$4 sm:$0xff]  }
 0x294   :  { %3168 = vmatprep.subr.bf16.mxu1 %v4605_v23  ;;  %v4626_v23 = vld [vmem:[#allocation13 + $0x2c] ss:$16 sps:$4 sm:$0xff]  }
 0x297   :  { %3169 = vmatpush1.bf16.msra.mxu1 %v4603_v21  ;;  %v4618_v21 = vld [vmem:[#allocation13 + $0x48] ss:$16 sps:$4 sm:$0xff]  }
 0x298   :  { %3170 = vmatprep.subr.bf16.mxu1 %v4611_v24  ;;  %v4632_v24 = vld [vmem:[#allocation13 + $0xc] ss:$16 sps:$4 sm:$0xff]  }
 0x29b   :  { %3171 = vmatpush1.bf16.msra.mxu1 %v4609_v22  ;;  %v4624_v22 = vld [vmem:[#allocation13 + $0x28] ss:$16 sps:$4 sm:$0xff]  }
 0x29c   :  { %3172 = vmatprep.subr.bf16.mxu1 %v4617_v28  ;;  %v4638_v28 = vld [vmem:[#allocation13 + $0x1ec] ss:$16 sps:$4 sm:$0xff]  }
 0x29f   :  { %3173 = vmatpush1.bf16.msra.mxu1 %v4615_v27  ;;  %v4630_v27 = vld [vmem:[#allocation13 + $0x8] ss:$16 sps:$4 sm:$0xff]  }
 0x2a0   :  { %3174 = vmatprep.subr.bf16.mxu1 %v4623_v30  ;;  %v4644_v30 = vld [vmem:[#allocation13 + $0x1cc] ss:$16 sps:$4 sm:$0xff]  }
 0x2a3   :  { %3175 = vmatpush1.bf16.msra.mxu1 %v4621_v29  ;;  %v4636_v29 = vld [vmem:[#allocation13 + $0x1e8] ss:$16 sps:$4 sm:$0xff]  }
 0x2a4   :  { %3176 = vmatprep.subr.bf16.mxu1 %v4629_v32  ;;  %v4650_v32 = vld [vmem:[#allocation13 + $0x1ac] ss:$16 sps:$4 sm:$0xff]  }
 0x2a7   :  { %3177 = vmatpush1.bf16.msra.mxu1 %v4627_v31  ;;  %v4642_v31 = vld [vmem:[#allocation13 + $0x1c8] ss:$16 sps:$4 sm:$0xff]  }
 0x2a8   :  { %3178 = vmatprep.subr.bf16.mxu1 %v4635_v34  ;;  %v4656_v34 = vld [vmem:[#allocation13 + $0x18c] ss:$16 sps:$4 sm:$0xff]  }
 0x2ab   :  { %3179 = vmatpush2.bf16.msra.mxu1 %v4633_v33  ;;  %v4648_v33 = vld [vmem:[#allocation13 + $0x1a8] ss:$16 sps:$4 sm:$0xff]  }
 0x2ac   :  { %3180 = vmatprep.subr.bf16.mxu1 %v4641_v36  ;;  %v4662_v36 = vld [vmem:[#allocation13 + $0x16c] ss:$16 sps:$4 sm:$0xff]  }
 0x2af   :  { %3181 = vmatpush2.bf16.msra.mxu1 %v4639_v35  ;;  %v4654_v35 = vld [vmem:[#allocation13 + $0x188] ss:$16 sps:$4 sm:$0xff]  }
 0x2b0   :  { %3182 = vmatprep.subr.bf16.mxu1 %v4647_v38  ;;  %v4668_v38 = vld [vmem:[#allocation13 + $0x14c] ss:$16 sps:$4 sm:$0xff]  }
 0x2b3   :  { %3183 = vmatpush2.bf16.msra.mxu1 %v4645_v37  ;;  %v4660_v37 = vld [vmem:[#allocation13 + $0x168] ss:$16 sps:$4 sm:$0xff]  }
 0x2b4   :  { %3184 = vmatprep.subr.bf16.mxu1 %v4653_v40  ;;  %v4666_v40 = vld [vmem:[#allocation13 + $0x148] ss:$16 sps:$4 sm:$0xff]  }
 0x2b7   :  { %3185 = vmatpush2.bf16.msra.mxu1 %v4651_v39  ;;  %v1510_v39 = vrot.slane %v5111_v54, %v5066_v19 }
 0x2b8   :  { %3186 = vmatprep.subr.bf16.mxu1 %v4659_v42  ;;  %v1514_v42 = vrot.slane %v5111_v54, %v5073_v26 }
 0x2bb   :  { %3187 = vmatpush2.bf16.msra.mxu1 %v4657_v41  ;;  %v4674_v41 = vld [vmem:[#allocation13 + $0x12c] ss:$16 sps:$4 sm:$0xff]  }
 0x2bc   :  { %3188 = vmatprep.subr.bf16.mxu1 %v4665_v44  ;;  %v4672_v44 = vld [vmem:[#allocation13 + $0x128] ss:$16 sps:$4 sm:$0xff]  }
 0x2bf   :  { %3189 = vmatpush2.bf16.msra.mxu1 %v4663_v43 }
 0x2c0   :  { %3190 = vmatprep.subr.bf16.mxu1 %v4671_v45 }
 0x2c3   :  { %3191 = vmatpush2.bf16.msra.mxu1 %v4669_v47 }
 0x2c4   :  { %3192 = vmatprep.subr.bf16.mxu1 %v4677_v49 }
 0x2c7   :  { %3193 = vmatpush2.bf16.msra.mxu1 %v4675_v51  ;;  %v4678_v51 = vld [vmem:[#allocation13 + $0x108] ss:$16 sps:$4 sm:$0xff]  }
 0x2c8   :  { %3244 = vmatprep.subr.bf16.mxu1 %v4683_v53 }
 0x2ca   :  { %v2193_v46 = vpop.f32.mrf.mxu0 }
 0x2cb   :  { %v2194_v59 = vadd.f32 %v2193_v46, %v1502_v55  ;;  %v4680_v46 = vld [vmem:[#allocation13 + $0x10c] ss:$16 sps:$4 sm:$0xff]  }
 0x2cc   :  { %v2195_v48 = vpop.f32.mrf.mxu0 }
 0x2cd   :  { %v2196_v62 = vadd.f32 %v2195_v48, %v1506_v56 }
 0x2ce   :  { %v2197_v50 = vpop.f32.mrf.mxu0 }
 0x2d0   :  { %v2198_v52 = vpop.f32.mrf.mxu0 }
 0x30a   :  { %v2234_v60 = vpop.f32.mrf.mxu1  ;;  %v5117_v61 = vpop.f32.mrf.mxu0 }
 0x30b   :  { %v2235_v63 = vadd.f32 %v2234_v60, %v2194_v59  ;;  %v2276_v43 = vadd.f32 %v5117_v61, %v1510_v39  ;;  %v4681_v59 = vld [vmem:[#allocation13 + $0x2e8] ss:$16 sps:$4 sm:$0xff]   ;;  %v4686_v61 = vld [vmem:[#allocation13 + $0x2cc] ss:$16 sps:$4 sm:$0xff]  }
 0x30c   :  { %v2236_v0 = vpop.f32.mrf.mxu1  ;;  %v5119_v1 = vpop.f32.mrf.mxu0  ;;  %v4728_v39 = vld [vmem:[#allocation13 + $0x30c] ss:$16 sps:$4 sm:$0xff]  }
 0x30d   :  { %v2237_v2 = vadd.f32 %v2236_v0, %v2196_v62  ;;  %v2323_v4 = vmax.f32 %v2235_v63, 0.0  ;;  %v2278_v47 = vadd.f32 %v5119_v1, %v1514_v42  ;;  %v4684_v62 = vld [vmem:[#allocation13 + $0x2c8] ss:$16 sps:$4 sm:$0xff]   ;;  %v4689_v63 = vld [vmem:[#allocation13 + $0x2ac] ss:$16 sps:$4 sm:$0xff]  }
 0x30e   :  { %v2238_v5 = vpop.f32.mrf.mxu1  ;;  %v2279_v6 = vpop.f32.mrf.mxu0  ;;  %v4687_v0 = vld [vmem:[#allocation13 + $0x2a8] ss:$16 sps:$4 sm:$0xff]   ;;  %v4692_v1 = vld [vmem:[#allocation13 + $0x28c] ss:$16 sps:$4 sm:$0xff]  }
 0x30f   :  { %v2324_v7 = vmax.f32 %v2237_v2, 0.0  ;;  %v5121_v10 = vpack.c.bf16 %v2323_v4, %v2323_v4  ;;  %v4729_v2 = vld [vmem:[#allocation14 + $0x78] sm:$0xff]   ;;  %v4731_v5 = vld [vmem:[#allocation14 + $0x70] sm:$0xff]   ;;  %v4742_v42 = vld [vmem:[#allocation14 + $0x8] sm:$0xff]  }
 0x310   :  { %v2239_v57 = vpop.f32.mrf.mxu1  ;;  %v2280_v3 = vpop.f32.mrf.mxu0  ;;  %v4730_v4 = vld [vmem:[#allocation14 + $0x38] sm:$0xff]  }
 0x311   :  { %v2328_v8 = vpack.c.bf16 %v2324_v7, %v2324_v7  ;;  %v4690_v6 = vld [vmem:[#allocation13 + $0x288] ss:$16 sps:$4 sm:$0xff]   ;;  %v4732_v7 = vld [vmem:[#allocation14 + $0x30] sm:$0xff]   ;;  %v4695_v57 = vld [vmem:[#allocation13 + $0x26c] ss:$16 sps:$4 sm:$0xff]  }
 0x312   :  { %v4733_v3 = vld [vmem:[#allocation14 + $0x68] sm:$0xff]  }
 0x313   :  { %3153 = vmatprep.mubr.bf16.mxu0 %v2328_v8 }
 0x314   :  { %3154 = vmatmul.mubr.bf16.vlgmr.msra.gmra.mxu0 %v5121_v10 }
 0x315   :  { %3204 = vmatpush1.bf16.msra.mxu0 %v4588_v58  ;;  %3235 = vmatprep.mubr.bf16.mxu0 %v2328_v8  ;;  %v4693_v8 = vld [vmem:[#allocation13 + $0x268] ss:$16 sps:$4 sm:$0xff]  }
 0x316   :  { %3205 = vmatprep.subr.bf16.mxu0 %v4596_v11  ;;  %v4734_v58 = vld [vmem:[#allocation14 + $0x28] sm:$0xff]   ;;  %v4735_v11 = vld [vmem:[#allocation14 + $0x60] sm:$0xff]  }
 0x319   :  { %3206 = vmatpush1.bf16.msra.mxu0 %v4594_v12  ;;  %v4696_v12 = vld [vmem:[#allocation13 + $0x248] ss:$16 sps:$4 sm:$0xff]  }
 0x31a   :  { %3207 = vmatprep.subr.bf16.mxu0 %v4602_v13  ;;  %v4736_v13 = vld [vmem:[#allocation14 + $0x20] sm:$0xff]  }
 0x31d   :  { %3208 = vmatpush1.bf16.msra.mxu0 %v4600_v14  ;;  %v4701_v14 = vld [vmem:[#allocation13 + $0x22c] ss:$16 sps:$4 sm:$0xff]  }
 0x31e   :  { %3209 = vmatprep.subr.bf16.mxu0 %v4608_v15  ;;  %v4737_v15 = vld [vmem:[#allocation14 + $0x58] sm:$0xff]  }
 0x321   :  { %3210 = vmatpush1.bf16.msra.mxu0 %v4606_v16  ;;  %v4699_v16 = vld [vmem:[#allocation13 + $0x228] ss:$16 sps:$4 sm:$0xff]  }
 0x322   :  { %3211 = vmatprep.subr.bf16.mxu0 %v4614_v17  ;;  %v4738_v17 = vld [vmem:[#allocation14 + $0x18] sm:$0xff]  }
 0x325   :  { %3212 = vmatpush1.bf16.msra.mxu0 %v4612_v20  ;;  %v4704_v20 = vld [vmem:[#allocation13 + $0x20c] ss:$16 sps:$4 sm:$0xff]  }
 0x326   :  { %3213 = vmatprep.subr.bf16.mxu0 %v4620_v9  ;;  %v4739_v9 = vld [vmem:[#allocation14 + $0x50] sm:$0xff]  }
 0x329   :  { %3214 = vmatpush1.bf16.msra.mxu0 %v4618_v21  ;;  %v4702_v21 = vld [vmem:[#allocation13 + $0x208] ss:$16 sps:$4 sm:$0xff]  }
 0x32a   :  { %3215 = vmatprep.subr.bf16.mxu0 %v4626_v23  ;;  %v4740_v23 = vld [vmem:[#allocation14 + $0x10] sm:$0xff]  }
 0x32d   :  { %3216 = vmatpush1.bf16.msra.mxu0 %v4624_v22  ;;  %v4707_v22 = vld [vmem:[#allocation13 + $0x3ec] ss:$16 sps:$4 sm:$0xff]  }
 0x32e   :  { %3217 = vmatprep.subr.bf16.mxu0 %v4632_v24  ;;  %v4705_v24 = vld [vmem:[#allocation13 + $0x3e8] ss:$16 sps:$4 sm:$0xff]  }
 0x331   :  { %3218 = vmatpush1.bf16.msra.mxu0 %v4630_v27  ;;  %v4710_v27 = vld [vmem:[#allocation13 + $0x3cc] ss:$16 sps:$4 sm:$0xff]  }
 0x332   :  { %3219 = vmatprep.subr.bf16.mxu0 %v4638_v28  ;;  %v4708_v28 = vld [vmem:[#allocation13 + $0x3c8] ss:$16 sps:$4 sm:$0xff]  }
 0x335   :  { %3220 = vmatpush2.bf16.msra.mxu0 %v4636_v29  ;;  %v4713_v29 = vld [vmem:[#allocation13 + $0x3ac] ss:$16 sps:$4 sm:$0xff]  }
 0x336   :  { %3221 = vmatprep.subr.bf16.mxu0 %v4644_v30  ;;  %v4711_v30 = vld [vmem:[#allocation13 + $0x3a8] ss:$16 sps:$4 sm:$0xff]  }
 0x339   :  { %3222 = vmatpush2.bf16.msra.mxu0 %v4642_v31  ;;  %v4716_v31 = vld [vmem:[#allocation13 + $0x38c] ss:$16 sps:$4 sm:$0xff]  }
 0x33a   :  { %3223 = vmatprep.subr.bf16.mxu0 %v4650_v32  ;;  %v4714_v32 = vld [vmem:[#allocation13 + $0x388] ss:$16 sps:$4 sm:$0xff]  }
 0x33d   :  { %3224 = vmatpush2.bf16.msra.mxu0 %v4648_v33  ;;  %v4719_v33 = vld [vmem:[#allocation13 + $0x36c] ss:$16 sps:$4 sm:$0xff]  }
 0x33e   :  { %3225 = vmatprep.subr.bf16.mxu0 %v4656_v34  ;;  %v4717_v34 = vld [vmem:[#allocation13 + $0x368] ss:$16 sps:$4 sm:$0xff]  }
 0x341   :  { %3226 = vmatpush2.bf16.msra.mxu0 %v4654_v35  ;;  %v4722_v35 = vld [vmem:[#allocation13 + $0x34c] ss:$16 sps:$4 sm:$0xff]  }
 0x342   :  { %3227 = vmatprep.subr.bf16.mxu0 %v4662_v36  ;;  %v4720_v36 = vld [vmem:[#allocation13 + $0x348] ss:$16 sps:$4 sm:$0xff]  }
 0x345   :  { %3228 = vmatpush2.bf16.msra.mxu0 %v4660_v37  ;;  %v4725_v37 = vld [vmem:[#allocation13 + $0x32c] ss:$16 sps:$4 sm:$0xff]  }
 0x346   :  { %3229 = vmatprep.subr.bf16.mxu0 %v4668_v38  ;;  %v4723_v38 = vld [vmem:[#allocation13 + $0x328] ss:$16 sps:$4 sm:$0xff]  }
 0x349   :  { %3230 = vmatpush2.bf16.msra.mxu0 %v4666_v40  ;;  %v4726_v40 = vld [vmem:[#allocation13 + $0x308] ss:$16 sps:$4 sm:$0xff]  }
 0x34a   :  { %v2316_v45 = vpop.f32.mrf.mxu1  ;;  %3231 = vmatprep.subr.bf16.mxu0 %v4674_v41  ;;  %v4741_v41 = vld [vmem:[#allocation14 + $0x48] sm:$0xff]  }
 0x34b   :  { %v2317_v48 = vadd.f32 %v2316_v45, %v2276_v43  ;;  %v4743_v43 = vld [vmem:[#allocation14 + $0x40] sm:$0xff]   ;;  %v4745_v45 = vld [vmem:[#allocation14 + $0xf8] sm:$0xff]  }
 0x34c   :  { %v2318_v49 = vpop.f32.mrf.mxu1 }
 0x34d   :  { %v2319_v50 = vadd.f32 %v2318_v49, %v2278_v47  ;;  %3232 = vmatpush2.bf16.msra.mxu0 %v4672_v44  ;;  %v2325_v52 = vmax.f32 %v2317_v48, 0.0  ;;  %v4744_v44 = vld [vmem:[#allocation14] sm:$0xff]   ;;  %v4747_v47 = vld [vmem:[#allocation14 + $0xf0] sm:$0xff]   ;;  %v4749_v49 = vld [vmem:[#allocation14 + $0xe8] sm:$0xff]  }
 0x34e   :  { %v2320_v53 = vpop.f32.mrf.mxu1  ;;  %3233 = vmatprep.subr.bf16.mxu0 %v4680_v46  ;;  %v4746_v46 = vld [vmem:[#allocation14 + $0xb8] sm:$0xff]   ;;  %v4748_v48 = vld [vmem:[#allocation14 + $0xb0] sm:$0xff]  }
 0x34f   :  { %v2326_v55 = vmax.f32 %v2319_v50, 0.0  ;;  %v5130_v60 = vpack.c.bf16 %v2325_v52, %v2325_v52  ;;  %v4750_v50 = vld [vmem:[#allocation14 + $0xa8] sm:$0xff]   ;;  %v4752_v52 = vld [vmem:[#allocation14 + $0xa0] sm:$0xff]   ;;  %v4753_v53 = vld [vmem:[#allocation14 + $0xd8] sm:$0xff]  }
 0x350   :  { %v2321_v56 = vpop.f32.mrf.mxu1 }
 0x351   :  { %v2330_v54 = vpack.c.bf16 %v2326_v55, %v2326_v55  ;;  %3234 = vmatpush2.bf16.msra.mxu0 %v4678_v51  ;;  %v4751_v51 = vld [vmem:[#allocation14 + $0xe0] sm:$0xff]   ;;  %v4754_v55 = vld [vmem:[#allocation14 + $0x98] sm:$0xff]   ;;  %v4755_v56 = vld [vmem:[#allocation14 + $0xd0] sm:$0xff]  }
 0x352   :  { %4084 = vmatprep.subr.bf16.mxu0 %v4729_v2 }
 0x353   :  { %3194 = vmatprep.mubr.bf16.mxu1 %v2330_v54 }
 0x354   :  { %3195 = vmatmul.mubr.bf16.vlgmr.msra.gmra.mxu1 %v5130_v60  ;;  %3236 = vmatmul.mubr.bf16.vlgmr.msra.gmra.mxu0 %v5121_v10  ;;  %v4698_v10 = vld [vmem:[#allocation13 + $0x24c] ss:$16 sps:$4 sm:$0xff]  }
 0x355   :  { %3245 = vmatpush1.bf16.msra.mxu1 %v4681_v59  ;;  %3276 = vmatprep.mubr.bf16.mxu1 %v2330_v54  ;;  %v4756_v54 = vld [vmem:[#allocation14 + $0x90] sm:$0xff]  }
 0x356   :  { %3246 = vmatprep.subr.bf16.mxu1 %v4686_v61  ;;  %4085 = vmatpush3.bf16.msra.mxu0 %v4730_v4  ;;  %v4758_v61 = vld [vmem:[#allocation14 + $0x88] sm:$0xff]   ;;  %v2459_v4 = vld [vmem:[%s5155_s10] sm:$0xf] }
 0x357   :  { %4086 = vmatprep.subr.bf16.mxu0 %v4731_v5  ;;  %v2464_v5 = vrot.slane %v2459_v4, %v5064_v18  ;;  %v2472_v18 = vrot.slane %v2459_v4, %v5066_v19 }
 0x359   :  { %3247 = vmatpush1.bf16.msra.mxu1 %v4684_v62 }
 0x35a   :  { %3248 = vmatprep.subr.bf16.mxu1 %v4689_v63  ;;  %4087 = vmatpush3.bf16.msra.mxu0 %v4732_v7 }
 0x35b   :  { %4088 = vmatprep.subr.bf16.mxu0 %v4733_v3 }
 0x35d   :  { %3249 = vmatpush1.bf16.msra.mxu1 %v4687_v0  ;;  %v4759_v0 = vld [vmem:[#allocation14 + $0xc0] sm:$0xff]  }
 0x35e   :  { %3250 = vmatprep.subr.bf16.mxu1 %v4692_v1  ;;  %4089 = vmatpush3.bf16.msra.mxu0 %v4734_v58  ;;  %v4760_v1 = vld [vmem:[#allocation14 + $0x80] sm:$0xff]  }
 0x35f   :  { %4090 = vmatprep.subr.bf16.mxu0 %v4735_v11 }
 0x361   :  { %3251 = vmatpush1.bf16.msra.mxu1 %v4690_v6  ;;  %v2468_v6 = vrot.slane %v2459_v4, %v5071_v25  ;;  %v2476_v25 = vrot.slane %v2459_v4, %v5073_v26 }
 0x362   :  { %3252 = vmatprep.subr.bf16.mxu1 %v4695_v57  ;;  %4091 = vmatpush3.bf16.msra.mxu0 %v4736_v13 }
 0x363   :  { %4092 = vmatprep.subr.bf16.mxu0 %v4737_v15 }
 0x365   :  { %3253 = vmatpush1.bf16.msra.mxu1 %v4693_v8 }
 0x366   :  { %3254 = vmatprep.subr.bf16.mxu1 %v4698_v10  ;;  %4093 = vmatpush3.bf16.msra.mxu0 %v4738_v17 }
 0x367   :  { %4094 = vmatprep.subr.bf16.mxu0 %v4739_v9 }
 0x369   :  { %3255 = vmatpush1.bf16.msra.mxu1 %v4696_v12 }
 0x36a   :  { %3256 = vmatprep.subr.bf16.mxu1 %v4701_v14  ;;  %4095 = vmatpush3.bf16.msra.mxu0 %v4740_v23 }
 0x36b   :  { %4096 = vmatprep.subr.bf16.mxu0 %v4741_v41 }
 0x36d   :  { %3257 = vmatpush1.bf16.msra.mxu1 %v4699_v16 }
 0x36e   :  { %3258 = vmatprep.subr.bf16.mxu1 %v4704_v20  ;;  %4097 = vmatpush3.bf16.msra.mxu0 %v4742_v42  ;;  %v4082_v42 = vld [vmem:[#allocation2] ss:$0 sm:$0xff] }
 0x36f   :  { %4098 = vmatprep.subr.bf16.mxu0 %v4743_v43 }
 0x371   :  { %3259 = vmatpush1.bf16.msra.mxu1 %v4702_v21 }
 0x372   :  { %3260 = vmatprep.subr.bf16.mxu1 %v4707_v22  ;;  %4099 = vmatpush3.bf16.msra.mxu0 %v4744_v44 }
 0x375   :  { %3261 = vmatpush2.bf16.msra.mxu1 %v4705_v24 }
 0x376   :  { %3262 = vmatprep.subr.bf16.mxu1 %v4710_v27 }
 0x379   :  { %3263 = vmatpush2.bf16.msra.mxu1 %v4708_v28 }
 0x37a   :  { %3264 = vmatprep.subr.bf16.mxu1 %v4713_v29 }
 0x37d   :  { %3265 = vmatpush2.bf16.msra.mxu1 %v4711_v30 }
 0x37e   :  { %3266 = vmatprep.subr.bf16.mxu1 %v4716_v31 }
 0x381   :  { %3267 = vmatpush2.bf16.msra.mxu1 %v4714_v32 }
 0x382   :  { %3268 = vmatprep.subr.bf16.mxu1 %v4719_v33 }
 0x385   :  { %3269 = vmatpush2.bf16.msra.mxu1 %v4717_v34 }
 0x386   :  { %3270 = vmatprep.subr.bf16.mxu1 %v4722_v35 }
 0x389   :  { %3271 = vmatpush2.bf16.msra.mxu1 %v4720_v36 }
 0x38a   :  { %3272 = vmatprep.subr.bf16.mxu1 %v4725_v37 }
 0x38d   :  { %3273 = vmatpush2.bf16.msra.mxu1 %v4723_v38 }
 0x38e   :  { %3274 = vmatprep.subr.bf16.mxu1 %v4728_v39 }
 0x391   :  { %3275 = vmatpush2.bf16.msra.mxu1 %v4726_v40 }
 0x392   :  { %4106 = vmatprep.subr.bf16.mxu1 %v4745_v45 }
 0x394   :  { %3277 = vmatmul.mubr.bf16.vlgmr.msra.gmra.mxu1 %v5130_v60  ;;  %v4757_v60 = vld [vmem:[#allocation14 + $0xc8] sm:$0xff]  }
 0x395   :  { %4107 = vmatpush3.bf16.msra.mxu1 %v4746_v46 }
 0x396   :  { %4108 = vmatprep.subr.bf16.mxu1 %v4747_v47 }
 0x399   :  { %4109 = vmatpush3.bf16.msra.mxu1 %v4748_v48 }
 0x39a   :  { %4110 = vmatprep.subr.bf16.mxu1 %v4749_v49 }
 0x39d   :  { %4111 = vmatpush3.bf16.msra.mxu1 %v4750_v50 }
 0x39e   :  { %4112 = vmatprep.subr.bf16.mxu1 %v4751_v51 }
 0x3a1   :  { %4113 = vmatpush3.bf16.msra.mxu1 %v4752_v52 }
 0x3a2   :  { %4114 = vmatprep.subr.bf16.mxu1 %v4753_v53 }
 0x3a5   :  { %4115 = vmatpush3.bf16.msra.mxu1 %v4754_v55 }
 0x3a6   :  { %4116 = vmatprep.subr.bf16.mxu1 %v4755_v56 }
 0x3a9   :  { %4117 = vmatpush3.bf16.msra.mxu1 %v4756_v54 }
 0x3aa   :  { %4118 = vmatprep.subr.bf16.mxu1 %v4757_v60 }
 0x3ad   :  { %4119 = vmatpush3.bf16.msra.mxu1 %v4758_v61 }
 0x3ae   :  { %4120 = vmatprep.subr.bf16.mxu1 %v4759_v0 }
 0x3b1   :  { %4121 = vmatpush3.bf16.msra.mxu1 %v4760_v1 }
 0x3d4   :  { %v3155_v59 = vpop.f32.mrf.mxu0 }
 0x3d5   :  { %v3156_v7 = vadd.f32 %v3155_v59, %v2464_v5 }
 0x3d6   :  { %v3157_v62 = vpop.f32.mrf.mxu0 }
 0x3d7   :  { %v3158_v8 = vadd.f32 %v3157_v62, %v2468_v6 }
 0x3d8   :  { %v3159_v63 = vpop.f32.mrf.mxu0 }
 0x3da   :  { %v3160_v2 = vpop.f32.mrf.mxu0 }
 0x414   :  { %v3196_v57 = vpop.f32.mrf.mxu1  ;;  %v3237_v3 = vpop.f32.mrf.mxu0 }
 0x415   :  { %v3197_v58 = vadd.f32 %v3196_v57, %v3156_v7  ;;  %v3238_v23 = vadd.f32 %v3237_v3, %v2472_v18 }
 0x416   :  { %v3198_v10 = vpop.f32.mrf.mxu1  ;;  %v3239_v11 = vpop.f32.mrf.mxu0 }
 0x417   :  { %v3199_v12 = vadd.f32 %v3198_v10, %v3158_v8  ;;  %v3285_v13 = vmax.f32 %v3197_v58, 0.0  ;;  %v3240_v24 = vadd.f32 %v3239_v11, %v2476_v25 }
 0x418   :  { %v3200_v14 = vpop.f32.mrf.mxu1  ;;  %v3241_v15 = vpop.f32.mrf.mxu0 }
 0x419   :  { %v3286_v16 = vmax.f32 %v3199_v12, 0.0  ;;  %v3289_v21 = vpack.c.bf16 %v3285_v13, %v3285_v13 }
 0x41a   :  { %v3201_v17 = vpop.f32.mrf.mxu1  ;;  %v3242_v20 = vpop.f32.mrf.mxu0 }
 0x41b   :  { %v3290_v9 = vpack.c.bf16 %v3286_v16, %v3286_v16 }
 0x41d   :  { %3581 = vmatprep.mubr.bf16.mxu0 %v3290_v9 }
 0x41e   :  { %3582 = vmatmul.mubr.bf16.vlgmr.msra.gmra.mxu0 %v3289_v21 }
 0x454   :  { %v3278_v22 = vpop.f32.mrf.mxu1 }
 0x455   :  { %v3279_v27 = vadd.f32 %v3278_v22, %v3238_v23 }
 0x456   :  { %v3280_v28 = vpop.f32.mrf.mxu1 }
 0x457   :  { %v3281_v29 = vadd.f32 %v3280_v28, %v3240_v24  ;;  %v3287_v30 = vmax.f32 %v3279_v27, 0.0 }
 0x458   :  { %v3282_v31 = vpop.f32.mrf.mxu1 }
 0x459   :  { %v3288_v32 = vmax.f32 %v3281_v29, 0.0  ;;  %v3291_v35 = vpack.c.bf16 %v3287_v30, %v3287_v30 }
 0x45a   :  { %v3283_v33 = vpop.f32.mrf.mxu1 }
 0x45b   :  { %v3292_v34 = vpack.c.bf16 %v3288_v32, %v3288_v32 }
 0x45d   :  { %3621 = vmatprep.mubr.bf16.mxu1 %v3292_v34 }
 0x45e   :  { %3622 = vmatmul.mubr.bf16.vlgmr.msra.gmra.mxu1 %v3291_v35 }
 0x4de   :  { %v4100_v36 = vpop.f32.mrf.mxu0 }
 0x4e0   :  { %v4101_v37 = vpop.f32.mrf.mxu0 }
 0x4e1   :  { %v4102_v38 = vadd.f32 %v4101_v37, %v4100_v36 }
 0x4e2   :  { %v4103_v19 = vpop.f32.mrf.mxu0 }
 0x4e4   :  { %v4104_v39 = vpop.f32.mrf.mxu0 }
 0x51e   :  { %v4122_v26 = vpop.f32.mrf.mxu1 }
 0x520   :  { %v4123_v40 = vpop.f32.mrf.mxu1 }
 0x521   :  { %v4124_v41 = vadd.f32 %v4123_v40, %v4122_v26 }
 0x522   :  { %v4125_v43 = vpop.f32.mrf.mxu1 }
 0x523   :  { %v3624_v44 = vadd.f32 %v4124_v41, %v4102_v38 }
 0x524   :  { %v4126_v45 = vpop.f32.mrf.mxu1 }
 0x525   :  { %v3636_v46 = vadd.f32 %v4082_v42, %v3624_v44 }
 0x527   :  { %v4083_v47 = vmul.f32 -1.442695, %v3636_v46 }
 0x529   :  { %4761 = vpow2.f32 %v4083_v47 }
 0x536   :  { %v4762_v48 = vpop.eup %4761 }
 0x537   :  { %v3640_v49 = vadd.f32 1.0, %v4762_v48 }
 0x539   :  { %4763 = vrcp.f32 %v3640_v49 }
 0x546   :  { %v4764_v50 = vpop.eup %4763 }
 0x547   :  { %3644 = vst.msk [vmem:[%s5158_s13] sm:$0xff] %vm3643_vm1, %v4764_v50 }
 0x548   :  { %3649 = vsyncpa [#allocation4], 1 }
 0x549   :  { %3650 = vsyncpa [#allocation6], 1 }
 0x54a   :  { %3651 = vsyncpa [#allocation9], 1 }
 0x54b   :  { %3652 = vsyncpa [#allocation12], 1 }
 0x54c   :  { %3653 = vsyncpa [#allocation15], 1 }

</bundles_post_ra>
